<compile_context>
chip_gen: v6e
topology: v6e:2x2x1
jax: 0.10.0
libtpu: 0.0.40
codegen_flags: <defaults>
</compile_context>

<pallas_src>
import functools
import math

import jax
import jax.numpy as jnp
from jax.experimental import pallas as pl
from jax.experimental.pallas import tpu as pltpu

_PAD_NEG = -1e30  # mask value for padded class lanes / out-of-group clips


# ---------------------------------------------------------------------------
# Pallas kernel: the whole forward pass runs in VMEM, grid-less.
# ---------------------------------------------------------------------------
def classifier_kernel(x_ref, vec_ref, w1_ref, w2_ref, wb_ref, wc_ref, out_ref,
                      *, B, T, num_class):
    BT = B * T
    inv_T = 1.0 / T
    inv_BT = 1.0 / BT

    def lin(h, w, bias):
        # bf16 x bf16 MXU matmul with f32 accumulate; bias already BN-folded.
        return jnp.dot(h.astype(jnp.bfloat16), w,
                       preferred_element_type=jnp.float32) + bias

    def lin_relu(h, w, bias):
        return jnp.maximum(lin(h, w, bias), 0.0)   # Dropout (eval) == identity

    # ---------------- gsf ----------------
    h = lin_relu(x_ref[...], w1_ref[...], vec_ref[:, 0:512])        # (BT, 512)
    feat = lin_relu(h, w2_ref[...], vec_ref[:, 512:768])            # (BT, 256)

    # ---------------- gsd (spatial domain head) ----------------
    g = lin_relu(feat, wb_ref[:, 0:256], vec_ref[:, 768:1024])      # (BT, 256)
    g = lin_relu(g, wb_ref[:, 256:512], vec_ref[:, 1024:1280])      # (BT, 256)
    # gsd_fc3 (256 -> 1) as a VPU mul + XLU lane-reduce (no N=1 MXU matmul).
    z = (jnp.sum(g * vec_ref[:, 1280:1536], axis=1, keepdims=True)
         + vec_ref[:, 1536:1537])                                   # (BT, 1)

    # Per-batch LogSoftmax over the T clips, then global mean
    # (ReverseLayerF forward is identity).  Pure VPU/XLU mask-reductions.
    row = jax.lax.broadcasted_iota(jnp.int32, (BT, B), 0)
    col = jax.lax.broadcasted_iota(jnp.int32, (BT, B), 1)
    in_grp = jnp.logical_and(row >= col * T, row < col * T + T)     # (BT, B)
    zm = jnp.where(in_grp, z, _PAD_NEG)                             # (BT, B)
    m_b = jnp.max(zm, axis=0, keepdims=True)                        # (1, B) per-batch max
    e = jnp.where(in_grp, jnp.exp(z - m_b), 0.0)                    # (BT, B)
    lse = jnp.log(jnp.sum(e, axis=0, keepdims=True)) + m_b          # (1, B)
    # mean_{b,t}(z - lse[b]) == (sum z - T * sum lse) / (B*T)
    spat = (jnp.sum(z, keepdims=True)
            - T * jnp.sum(lse, keepdims=True)) * inv_BT             # (1, 1)

    # ---------------- temporal aggregation (mean over T) ----------------
    r2 = jax.lax.broadcasted_iota(jnp.int32, (B, BT), 0)
    c2 = jax.lax.broadcasted_iota(jnp.int32, (B, BT), 1)
    agg = jnp.logical_and(c2 >= r2 * T, c2 < r2 * T + T).astype(jnp.bfloat16)
    tagg = jnp.dot(agg, feat.astype(jnp.bfloat16),
                   preferred_element_type=jnp.float32) * inv_T      # (B, 256)

    # ---------------- gtd (temporal domain head, 100 padded to 128) ------
    t1 = lin_relu(tagg, wb_ref[:, 512:640], vec_ref[:, 1664:1792])  # (B, 128)
    t2 = lin_relu(t1, wc_ref[:, 0:128], vec_ref[:, 1792:1920])      # (B, 128)

    # ---------------- gy (+ folded gtd_fc3 in lane 127) ----------------
    # TODO(synk): original feeds the 256-d temporal_aggregation into Linear(100, C)
    # (shape bug); here the 100-d gtd hidden feature is used instead.
    logits = lin(t2, wc_ref[:, 128:256], vec_ref[:, 1920:2048])     # (B, 128)
    tdom = 1.0 / (1.0 + jnp.exp(-logits[:, 127:128]))               # Sigmoid(gtd_fc3)

    lane = jax.lax.broadcasted_iota(jnp.int32, (B, 128), 1)
    cls_logits = jnp.where(lane < num_class, logits, _PAD_NEG)
    lm = jnp.max(cls_logits, axis=1, keepdims=True)
    cls = cls_logits - (jnp.log(jnp.sum(jnp.exp(cls_logits - lm),
                                        axis=1, keepdims=True)) + lm)

    # Packed lane-dense output, two unmasked 128-lane stores:
    # lanes [0:128) class log-softmax | lane 128 sigmoid | lane 129 spatial mean.
    out_ref[:, 0:128] = cls
    out_ref[:, 128:256] = jnp.where(lane == 0, tdom,
                                    jnp.where(lane == 1, spat, 0.0))


# ---------------------------------------------------------------------------
# Parameter construction (deterministic, PyTorch-default-style init)
# ---------------------------------------------------------------------------
def _init_linear(key, fan_in, fan_out):
    kw, kb = jax.random.split(key)
    bound = 1.0 / math.sqrt(fan_in)
    w = jax.random.uniform(kw, (fan_in, fan_out), jnp.float32, -bound, bound)
    b = jax.random.uniform(kb, (fan_out,), jnp.float32, -bound, bound)
    return w, b


def _bn_fold(n, eps=1e-5):
    gamma = jnp.ones((n,), jnp.float32)
    beta = jnp.zeros((n,), jnp.float32)
    run_mean = jnp.zeros((n,), jnp.float32)
    run_var = jnp.ones((n,), jnp.float32)
    scale = gamma / jnp.sqrt(run_var + eps)
    shift = beta - run_mean * scale
    return scale, shift


def init_params(key, n_feat, num_class):
    """Raw parameters: Linear (W, b) plus eval-mode BN (scale, shift) where present."""
    ks = jax.random.split(key, 9)
    return {
        "gsf1": (*_init_linear(ks[0], n_feat, 512), *_bn_fold(512)),
        "gsf2": (*_init_linear(ks[1], 512, 256), *_bn_fold(256)),
        "gsd1": (*_init_linear(ks[2], 256, 256), *_bn_fold(256)),
        "gsd2": (*_init_linear(ks[3], 256, 256), *_bn_fold(256)),
        "gsd3": _init_linear(ks[4], 256, 1),
        "gtd1": (*_init_linear(ks[5], 256, 100), *_bn_fold(100)),
        "gtd2": (*_init_linear(ks[6], 100, 100), *_bn_fold(100)),
        "gtd3": _init_linear(ks[7], 100, 1),
        "gy":   _init_linear(ks[8], 100, num_class),
    }


def pack_params(p):
    """One-off host-side prep: fold BN into Linear, pad the 100-wide path to 128
    lanes, fold gtd_fc3 into lane 127 of the gy block, pack the eight small
    weights into two bf16 slabs, and pack all biases (+ the gsd_fc3 weight row)
    into a single (1, 2048) f32 vector slab."""
    def fold(w, b, s, t):
        return w * s[None, :], b * s + t

    w_gsf1, b_gsf1 = fold(*p["gsf1"])
    w_gsf2, b_gsf2 = fold(*p["gsf2"])
    w_gsd1, b_gsd1 = fold(*p["gsd1"])
    w_gsd2, b_gsd2 = fold(*p["gsd2"])
    w_gsd3, b_gsd3 = p["gsd3"]
    w_gtd1, b_gtd1 = fold(*p["gtd1"])
    w_gtd2, b_gtd2 = fold(*p["gtd2"])
    w_gtd3, b_gtd3 = p["gtd3"]
    w_gy, b_gy = p["gy"]

    H = 128
    C = w_gy.shape[1]
    assert C <= H - 2, "num_class must leave lane 127 free for the folded gtd_fc3"

    def pad_w(w, rows, cols):
        return jnp.zeros((rows, cols), w.dtype).at[:w.shape[0], :w.shape[1]].set(w)

    w_gtd1 = pad_w(w_gtd1, 256, H)
    w_gtd2 = pad_w(w_gtd2, H, H)
    # gy padded to (128,128); lane 127 carries the gtd_fc3 (100 -> 1) column.
    w_gy_c = pad_w(w_gy, H, H).at[:w_gtd3.shape[0], H - 1].set(w_gtd3[:, 0])

    b_gtd1 = jnp.zeros((H,), jnp.float32).at[:100].set(b_gtd1)
    b_gtd2 = jnp.zeros((H,), jnp.float32).at[:100].set(b_gtd2)
    b_gy_c = jnp.zeros((H,), jnp.float32).at[:C].set(b_gy).at[H - 1].set(b_gtd3[0])

    # (1, 2048) f32 vector slab, 128-aligned segments.
    vec = jnp.zeros((1, 2048), jnp.float32)
    vec = vec.at[0, 0:512].set(b_gsf1)
    vec = vec.at[0, 512:768].set(b_gsf2)
    vec = vec.at[0, 768:1024].set(b_gsd1)
    vec = vec.at[0, 1024:1280].set(b_gsd2)
    vec = vec.at[0, 1280:1536].set(w_gsd3[:, 0])     # gsd_fc3 weight row
    vec = vec.at[0, 1536].set(b_gsd3[0])             # gsd_fc3 bias
    vec = vec.at[0, 1664:1792].set(b_gtd1)
    vec = vec.at[0, 1792:1920].set(b_gtd2)
    vec = vec.at[0, 1920:2048].set(b_gy_c)           # gy bias (+ gtd_fc3 bias in lane 127)

    # Two contiguous bf16 weight slabs (fewer, larger DMAs).
    wB = jnp.concatenate([w_gsd1, w_gsd2, w_gtd1], axis=1).astype(jnp.bfloat16)  # (256, 640)
    wC = jnp.concatenate([w_gtd2, w_gy_c], axis=1).astype(jnp.bfloat16)          # (128, 256)

    return (vec,
            w_gsf1.astype(jnp.bfloat16),   # (1024, 512)
            w_gsf2.astype(jnp.bfloat16),   # (512, 256)
            wB, wC)


# ---------------------------------------------------------------------------
# Wrapper
# ---------------------------------------------------------------------------
def _classifier_forward_impl(x, packed, num_class):
    """x: (B, T, F) float32. Returns (spatial_domain_out, temporal_domain_out, class_out).
    ReverseLayerF.forward is identity, so alpha never affects the forward pass."""
    B, T, F = x.shape
    x2d = x.reshape(B * T, F)                       # free metadata reshape, f32 in
    vec, w1, w2, wb, wc = packed
    inputs = (x2d, vec, w1, w2, wb, wc)

    kernel = functools.partial(classifier_kernel, B=B, T=T, num_class=num_class)
    vspec = pl.BlockSpec(memory_space=pltpu.MemorySpace.VMEM)
    out = pl.pallas_call(
        kernel,
        out_shape=jax.ShapeDtypeStruct((B, 256), jnp.float32),
        in_specs=[vspec] * len(inputs),
        out_specs=vspec,
        compiler_params=pltpu.CompilerParams(
            vmem_limit_bytes=8 * 1024 * 1024),
    )(*inputs)

    class_out = out[:, :num_class]
    temporal_domain_out = out[:, 128:129]
    spatial_domain_out = out[0, 129]
    return spatial_domain_out, temporal_domain_out, class_out


classifier_forward = jax.jit(_classifier_forward_impl, static_argnums=(2,))


# ---------------------------------------------------------------------------
if __name__ == "__main__":
    B, T, N_FEAT, NUM_CLASS = 2, 5, 1024, 8   # n_features = [5, 1024], temporal_type="pooling"
    key = jax.random.PRNGKey(0)
    kx, kp = jax.random.split(key)
    x = jax.random.normal(kx, (B, T, N_FEAT), jnp.float32)
    packed = pack_params(init_params(kp, N_FEAT, NUM_CLASS))

    spatial_out, temporal_out, class_out = jax.block_until_ready(
        classifier_forward(x, packed, NUM_CLASS))

    assert spatial_out.shape == ()
    assert temporal_out.shape == (B, 1)
    assert class_out.shape == (B, NUM_CLASS)
    assert bool(jnp.isfinite(spatial_out))
    assert bool(jnp.all(jnp.isfinite(temporal_out)))
    assert bool(jnp.all(jnp.isfinite(class_out)))
    print("KERNEL_OK")
</pallas_src>

<mosaic_0001>
module attributes {stable_mosaic.version = 11 : i64} {
  func.func @classifier_kernel(%arg0: memref<10x1024xf32, #tpu.memory_space<vmem>>, %arg1: memref<1x2048xf32, #tpu.memory_space<vmem>>, %arg2: memref<1024x512xbf16, #tpu.memory_space<vmem>>, %arg3: memref<512x256xbf16, #tpu.memory_space<vmem>>, %arg4: memref<256x640xbf16, #tpu.memory_space<vmem>>, %arg5: memref<128x256xbf16, #tpu.memory_space<vmem>>, %arg6: memref<2x256xf32, #tpu.memory_space<vmem>>) attributes {dimension_semantics = [], scalar_prefetch = 0 : i64, scratch_operands = 0 : i64, tpu.core_type = #tpu.core_type<tc>} {
    %c0 = arith.constant 0 : index
    %c0_0 = arith.constant 0 : index
    %0 = vector.load %arg0[%c0, %c0_0] : memref<10x1024xf32, #tpu.memory_space<vmem>>, vector<10x1024xf32>
    %c0_1 = arith.constant 0 : index
    %c0_2 = arith.constant 0 : index
    %1 = vector.load %arg2[%c0_1, %c0_2] : memref<1024x512xbf16, #tpu.memory_space<vmem>>, vector<1024x512xbf16>
    %c0_3 = arith.constant 0 : index
    %c0_4 = arith.constant 0 : index
    %2 = vector.load %arg1[%c0_3, %c0_4] : memref<1x2048xf32, #tpu.memory_space<vmem>>, vector<1x512xf32>
    %3 = arith.truncf %0 : vector<10x1024xf32> to vector<10x1024xbf16>
    %cst = arith.constant dense<0.000000e+00> : vector<10x512xf32>
    %4 = tpu.matmul %3, %1, %cst {dimension_numbers = #tpu.dot_dimension_numbers<[1], [0], [0], [1], [0, 0, 1, 1], [], []>} : vector<10x1024xbf16>, vector<1024x512xbf16>, vector<10x512xf32> -> vector<10x512xf32>
    %5 = vector.broadcast %2 : vector<1x512xf32> to vector<10x512xf32>
    %6 = arith.addf %4, %5 : vector<10x512xf32>
    %cst_5 = arith.constant 0.000000e+00 : f32
    %7 = vector.broadcast %cst_5 : f32 to vector<10x512xf32>
    %8 = arith.maximumf %6, %7 : vector<10x512xf32>
    %c0_6 = arith.constant 0 : index
    %c0_7 = arith.constant 0 : index
    %9 = vector.load %arg3[%c0_6, %c0_7] : memref<512x256xbf16, #tpu.memory_space<vmem>>, vector<512x256xbf16>
    %c0_8 = arith.constant 0 : index
    %c512 = arith.constant 512 : index
    %10 = vector.load %arg1[%c0_8, %c512] : memref<1x2048xf32, #tpu.memory_space<vmem>>, vector<1x256xf32>
    %11 = arith.truncf %8 : vector<10x512xf32> to vector<10x512xbf16>
    %cst_9 = arith.constant dense<0.000000e+00> : vector<10x256xf32>
    %12 = tpu.matmul %11, %9, %cst_9 {dimension_numbers = #tpu.dot_dimension_numbers<[1], [0], [0], [1], [0, 0, 1, 1], [], []>} : vector<10x512xbf16>, vector<512x256xbf16>, vector<10x256xf32> -> vector<10x256xf32>
    %13 = vector.broadcast %10 : vector<1x256xf32> to vector<10x256xf32>
    %14 = arith.addf %12, %13 : vector<10x256xf32>
    %cst_10 = arith.constant 0.000000e+00 : f32
    %15 = vector.broadcast %cst_10 : f32 to vector<10x256xf32>
    %16 = arith.maximumf %14, %15 : vector<10x256xf32>
    %c0_11 = arith.constant 0 : index
    %c0_12 = arith.constant 0 : index
    %17 = vector.load %arg4[%c0_11, %c0_12] : memref<256x640xbf16, #tpu.memory_space<vmem>>, vector<256x256xbf16>
    %c0_13 = arith.constant 0 : index
    %c768 = arith.constant 768 : index
    %18 = vector.load %arg1[%c0_13, %c768] : memref<1x2048xf32, #tpu.memory_space<vmem>>, vector<1x256xf32>
    %19 = arith.truncf %16 : vector<10x256xf32> to vector<10x256xbf16>
    %cst_14 = arith.constant dense<0.000000e+00> : vector<10x256xf32>
    %20 = tpu.matmul %19, %17, %cst_14 {dimension_numbers = #tpu.dot_dimension_numbers<[1], [0], [0], [1], [0, 0, 1, 1], [], []>} : vector<10x256xbf16>, vector<256x256xbf16>, vector<10x256xf32> -> vector<10x256xf32>
    %21 = vector.broadcast %18 : vector<1x256xf32> to vector<10x256xf32>
    %22 = arith.addf %20, %21 : vector<10x256xf32>
    %cst_15 = arith.constant 0.000000e+00 : f32
    %23 = vector.broadcast %cst_15 : f32 to vector<10x256xf32>
    %24 = arith.maximumf %22, %23 : vector<10x256xf32>
    %c0_16 = arith.constant 0 : index
    %c256 = arith.constant 256 : index
    %25 = vector.load %arg4[%c0_16, %c256] : memref<256x640xbf16, #tpu.memory_space<vmem>>, vector<256x256xbf16>
    %c0_17 = arith.constant 0 : index
    %c1024 = arith.constant 1024 : index
    %26 = vector.load %arg1[%c0_17, %c1024] : memref<1x2048xf32, #tpu.memory_space<vmem>>, vector<1x256xf32>
    %27 = arith.truncf %24 : vector<10x256xf32> to vector<10x256xbf16>
    %cst_18 = arith.constant dense<0.000000e+00> : vector<10x256xf32>
    %28 = tpu.matmul %27, %25, %cst_18 {dimension_numbers = #tpu.dot_dimension_numbers<[1], [0], [0], [1], [0, 0, 1, 1], [], []>} : vector<10x256xbf16>, vector<256x256xbf16>, vector<10x256xf32> -> vector<10x256xf32>
    %29 = vector.broadcast %26 : vector<1x256xf32> to vector<10x256xf32>
    %30 = arith.addf %28, %29 : vector<10x256xf32>
    %cst_19 = arith.constant 0.000000e+00 : f32
    %31 = vector.broadcast %cst_19 : f32 to vector<10x256xf32>
    %32 = arith.maximumf %30, %31 : vector<10x256xf32>
    %c0_20 = arith.constant 0 : index
    %c1280 = arith.constant 1280 : index
    %33 = vector.load %arg1[%c0_20, %c1280] : memref<1x2048xf32, #tpu.memory_space<vmem>>, vector<1x256xf32>
    %34 = vector.broadcast %33 : vector<1x256xf32> to vector<10x256xf32>
    %35 = arith.mulf %32, %34 : vector<10x256xf32>
    %cst_21 = arith.constant dense<0.000000e+00> : vector<10xf32>
    %36 = vector.multi_reduction <add>, %35, %cst_21 [1] : vector<10x256xf32> to vector<10xf32>
    %37 = vector.shape_cast %36 : vector<10xf32> to vector<10x1xf32>
    %c0_22 = arith.constant 0 : index
    %c1536 = arith.constant 1536 : index
    %38 = vector.load %arg1[%c0_22, %c1536] : memref<1x2048xf32, #tpu.memory_space<vmem>>, vector<1x1xf32>
    %39 = vector.broadcast %38 : vector<1x1xf32> to vector<10x1xf32>
    %40 = arith.addf %37, %39 : vector<10x1xf32>
    %41 = tpu.iota {dimensions = array<i32: 0>} : vector<10x2xi32>
    %42 = tpu.iota {dimensions = array<i32: 1>} : vector<10x2xi32>
    %c5_i32 = arith.constant 5 : i32
    %43 = vector.broadcast %c5_i32 : i32 to vector<10x2xi32>
    %44 = arith.muli %42, %43 : vector<10x2xi32>
    %45 = arith.cmpi sge, %41, %44 : vector<10x2xi32>
    %c5_i32_23 = arith.constant 5 : i32
    %46 = vector.broadcast %c5_i32_23 : i32 to vector<10x2xi32>
    %47 = arith.muli %42, %46 : vector<10x2xi32>
    %c5_i32_24 = arith.constant 5 : i32
    %48 = vector.broadcast %c5_i32_24 : i32 to vector<10x2xi32>
    %49 = arith.addi %47, %48 : vector<10x2xi32>
    %50 = arith.cmpi slt, %41, %49 : vector<10x2xi32>
    %51 = arith.andi %45, %50 : vector<10x2xi1>
    %cst_25 = arith.constant -1.000000e+30 : f32
    %52 = vector.shape_cast %40 : vector<10x1xf32> to vector<10x1xf32>
    %53 = vector.broadcast %52 : vector<10x1xf32> to vector<10x2xf32>
    %54 = vector.broadcast %cst_25 : f32 to vector<10x2xf32>
    %55 = arith.select %51, %53, %54 : vector<10x2xi1>, vector<10x2xf32>
    %cst_26 = arith.constant dense<0xFF800000> : vector<2xf32>
    %56 = vector.multi_reduction <maximumf>, %55, %cst_26 [0] : vector<10x2xf32> to vector<2xf32>
    %57 = vector.shape_cast %56 : vector<2xf32> to vector<1x2xf32>
    %58 = vector.broadcast %40 : vector<10x1xf32> to vector<10x2xf32>
    %59 = vector.broadcast %57 : vector<1x2xf32> to vector<10x2xf32>
    %60 = arith.subf %58, %59 : vector<10x2xf32>
    %61 = math.exp %60 : vector<10x2xf32>
    %cst_27 = arith.constant 0.000000e+00 : f32
    %62 = vector.broadcast %cst_27 : f32 to vector<10x2xf32>
    %63 = arith.select %51, %61, %62 : vector<10x2xi1>, vector<10x2xf32>
    %cst_28 = arith.constant dense<0.000000e+00> : vector<2xf32>
    %64 = vector.multi_reduction <add>, %63, %cst_28 [0] : vector<10x2xf32> to vector<2xf32>
    %65 = vector.shape_cast %64 : vector<2xf32> to vector<1x2xf32>
    %66 = math.log %65 : vector<1x2xf32>
    %67 = arith.addf %66, %57 : vector<1x2xf32>
    %68 = vector.shape_cast %40 : vector<10x1xf32> to vector<1x10x1xf32>
    %cst_29 = arith.constant dense<0.000000e+00> : vector<1xf32>
    %69 = vector.multi_reduction <add>, %68, %cst_29 [1, 2] : vector<1x10x1xf32> to vector<1xf32>
    %70 = vector.shape_cast %69 : vector<1xf32> to vector<1x1x1xf32>
    %71 = vector.extract %70[0, 0, 0] : f32 from vector<1x1x1xf32>
    %72 = vector.broadcast %71 : f32 to vector<1x1xf32>
    %73 = vector.shape_cast %67 : vector<1x2xf32> to vector<1x1x2xf32>
    %cst_30 = arith.constant dense<0.000000e+00> : vector<1xf32>
    %74 = vector.multi_reduction <add>, %73, %cst_30 [1, 2] : vector<1x1x2xf32> to vector<1xf32>
    %75 = vector.shape_cast %74 : vector<1xf32> to vector<1x1x1xf32>
    %76 = vector.extract %75[0, 0, 0] : f32 from vector<1x1x1xf32>
    %77 = vector.broadcast %76 : f32 to vector<1x1xf32>
    %cst_31 = arith.constant 5.000000e+00 : f32
    %78 = vector.broadcast %cst_31 : f32 to vector<1x1xf32>
    %79 = arith.mulf %78, %77 : vector<1x1xf32>
    %80 = arith.subf %72, %79 : vector<1x1xf32>
    %cst_32 = arith.constant 1.000000e-01 : f32
    %81 = vector.broadcast %cst_32 : f32 to vector<1x1xf32>
    %82 = arith.mulf %80, %81 : vector<1x1xf32>
    %83 = tpu.iota {dimensions = array<i32: 0>} : vector<2x10xi32>
    %84 = tpu.iota {dimensions = array<i32: 1>} : vector<2x10xi32>
    %c5_i32_33 = arith.constant 5 : i32
    %85 = vector.broadcast %c5_i32_33 : i32 to vector<2x10xi32>
    %86 = arith.muli %83, %85 : vector<2x10xi32>
    %87 = arith.cmpi sge, %84, %86 : vector<2x10xi32>
    %c5_i32_34 = arith.constant 5 : i32
    %88 = vector.broadcast %c5_i32_34 : i32 to vector<2x10xi32>
    %89 = arith.muli %83, %88 : vector<2x10xi32>
    %c5_i32_35 = arith.constant 5 : i32
    %90 = vector.broadcast %c5_i32_35 : i32 to vector<2x10xi32>
    %91 = arith.addi %89, %90 : vector<2x10xi32>
    %92 = arith.cmpi slt, %84, %91 : vector<2x10xi32>
    %93 = arith.andi %87, %92 : vector<2x10xi1>
    %94 = arith.extui %93 : vector<2x10xi1> to vector<2x10xi32>
    %95 = arith.sitofp %94 : vector<2x10xi32> to vector<2x10xf32>
    %96 = arith.truncf %95 : vector<2x10xf32> to vector<2x10xbf16>
    %97 = arith.truncf %16 : vector<10x256xf32> to vector<10x256xbf16>
    %cst_36 = arith.constant dense<0.000000e+00> : vector<2x256xf32>
    %98 = tpu.matmul %96, %97, %cst_36 {dimension_numbers = #tpu.dot_dimension_numbers<[1], [0], [0], [1], [0, 0, 1, 1], [], []>} : vector<2x10xbf16>, vector<10x256xbf16>, vector<2x256xf32> -> vector<2x256xf32>
    %cst_37 = arith.constant 2.000000e-01 : f32
    %99 = vector.broadcast %cst_37 : f32 to vector<2x256xf32>
    %100 = arith.mulf %98, %99 : vector<2x256xf32>
    %c0_38 = arith.constant 0 : index
    %c512_39 = arith.constant 512 : index
    %101 = vector.load %arg4[%c0_38, %c512_39] : memref<256x640xbf16, #tpu.memory_space<vmem>>, vector<256x128xbf16>
    %c0_40 = arith.constant 0 : index
    %c1664 = arith.constant 1664 : index
    %102 = vector.load %arg1[%c0_40, %c1664] : memref<1x2048xf32, #tpu.memory_space<vmem>>, vector<1x128xf32>
    %103 = arith.truncf %100 : vector<2x256xf32> to vector<2x256xbf16>
    %cst_41 = arith.constant dense<0.000000e+00> : vector<2x128xf32>
    %104 = tpu.matmul %103, %101, %cst_41 {dimension_numbers = #tpu.dot_dimension_numbers<[1], [0], [0], [1], [0, 0, 1, 1], [], []>} : vector<2x256xbf16>, vector<256x128xbf16>, vector<2x128xf32> -> vector<2x128xf32>
    %105 = vector.broadcast %102 : vector<1x128xf32> to vector<2x128xf32>
    %106 = arith.addf %104, %105 : vector<2x128xf32>
    %cst_42 = arith.constant 0.000000e+00 : f32
    %107 = vector.broadcast %cst_42 : f32 to vector<2x128xf32>
    %108 = arith.maximumf %106, %107 : vector<2x128xf32>
    %c0_43 = arith.constant 0 : index
    %c0_44 = arith.constant 0 : index
    %109 = vector.load %arg5[%c0_43, %c0_44] : memref<128x256xbf16, #tpu.memory_space<vmem>>, vector<128x128xbf16>
    %c0_45 = arith.constant 0 : index
    %c1792 = arith.constant 1792 : index
    %110 = vector.load %arg1[%c0_45, %c1792] : memref<1x2048xf32, #tpu.memory_space<vmem>>, vector<1x128xf32>
    %111 = arith.truncf %108 : vector<2x128xf32> to vector<2x128xbf16>
    %cst_46 = arith.constant dense<0.000000e+00> : vector<2x128xf32>
    %112 = tpu.matmul %111, %109, %cst_46 {dimension_numbers = #tpu.dot_dimension_numbers<[1], [0], [0], [1], [0, 0, 1, 1], [], []>} : vector<2x128xbf16>, vector<128x128xbf16>, vector<2x128xf32> -> vector<2x128xf32>
    %113 = vector.broadcast %110 : vector<1x128xf32> to vector<2x128xf32>
    %114 = arith.addf %112, %113 : vector<2x128xf32>
    %cst_47 = arith.constant 0.000000e+00 : f32
    %115 = vector.broadcast %cst_47 : f32 to vector<2x128xf32>
    %116 = arith.maximumf %114, %115 : vector<2x128xf32>
    %c0_48 = arith.constant 0 : index
    %c128 = arith.constant 128 : index
    %117 = vector.load %arg5[%c0_48, %c128] : memref<128x256xbf16, #tpu.memory_space<vmem>>, vector<128x128xbf16>
    %c0_49 = arith.constant 0 : index
    %c1920 = arith.constant 1920 : index
    %118 = vector.load %arg1[%c0_49, %c1920] : memref<1x2048xf32, #tpu.memory_space<vmem>>, vector<1x128xf32>
    %119 = arith.truncf %116 : vector<2x128xf32> to vector<2x128xbf16>
    %cst_50 = arith.constant dense<0.000000e+00> : vector<2x128xf32>
    %120 = tpu.matmul %119, %117, %cst_50 {dimension_numbers = #tpu.dot_dimension_numbers<[1], [0], [0], [1], [0, 0, 1, 1], [], []>} : vector<2x128xbf16>, vector<128x128xbf16>, vector<2x128xf32> -> vector<2x128xf32>
    %121 = vector.broadcast %118 : vector<1x128xf32> to vector<2x128xf32>
    %122 = arith.addf %120, %121 : vector<2x128xf32>
    %123 = vector.extract_strided_slice %122 {offsets = [0, 127], sizes = [2, 1], strides = [1, 1]} : vector<2x128xf32> to vector<2x1xf32>
    %cst_51 = arith.constant 0.000000e+00 : f32
    %124 = vector.broadcast %cst_51 : f32 to vector<2x1xf32>
    %125 = arith.subf %124, %123 : vector<2x1xf32>
    %126 = math.exp %125 : vector<2x1xf32>
    %cst_52 = arith.constant 1.000000e+00 : f32
    %127 = vector.broadcast %cst_52 : f32 to vector<2x1xf32>
    %128 = arith.addf %127, %126 : vector<2x1xf32>
    %cst_53 = arith.constant 1.000000e+00 : f32
    %129 = vector.broadcast %cst_53 : f32 to vector<2x1xf32>
    %130 = arith.divf %129, %128 : vector<2x1xf32>
    %131 = tpu.iota {dimensions = array<i32: 1>} : vector<2x128xi32>
    %c8_i32 = arith.constant 8 : i32
    %132 = vector.broadcast %c8_i32 : i32 to vector<2x128xi32>
    %133 = arith.cmpi slt, %131, %132 : vector<2x128xi32>
    %cst_54 = arith.constant -1.000000e+30 : f32
    %134 = vector.broadcast %cst_54 : f32 to vector<2x128xf32>
    %135 = arith.select %133, %122, %134 : vector<2x128xi1>, vector<2x128xf32>
    %cst_55 = arith.constant dense<0xFF800000> : vector<2xf32>
    %136 = vector.multi_reduction <maximumf>, %135, %cst_55 [1] : vector<2x128xf32> to vector<2xf32>
    %137 = vector.shape_cast %136 : vector<2xf32> to vector<2x1xf32>
    %138 = vector.broadcast %137 : vector<2x1xf32> to vector<2x128xf32>
    %139 = arith.subf %135, %138 : vector<2x128xf32>
    %140 = math.exp %139 : vector<2x128xf32>
    %cst_56 = arith.constant dense<0.000000e+00> : vector<2xf32>
    %141 = vector.multi_reduction <add>, %140, %cst_56 [1] : vector<2x128xf32> to vector<2xf32>
    %142 = vector.shape_cast %141 : vector<2xf32> to vector<2x1xf32>
    %143 = math.log %142 : vector<2x1xf32>
    %144 = arith.addf %143, %137 : vector<2x1xf32>
    %145 = vector.broadcast %144 : vector<2x1xf32> to vector<2x128xf32>
    %146 = arith.subf %135, %145 : vector<2x128xf32>
    %c0_57 = arith.constant 0 : index
    %c0_58 = arith.constant 0 : index
    %147 = vector.load %arg6[%c0_57, %c0_58] : memref<2x256xf32, #tpu.memory_space<vmem>>, vector<2x128xf32>
    tpu.vector_store %arg6[%c0_57, %c0_58], %146 {strides = array<i32>} : memref<2x256xf32, #tpu.memory_space<vmem>>, vector<2x128xf32>,
    %c0_i32 = arith.constant 0 : i32
    %148 = vector.broadcast %c0_i32 : i32 to vector<2x128xi32>
    %149 = arith.cmpi eq, %131, %148 : vector<2x128xi32>
    %c1_i32 = arith.constant 1 : i32
    %150 = vector.broadcast %c1_i32 : i32 to vector<2x128xi32>
    %151 = arith.cmpi eq, %131, %150 : vector<2x128xi32>
    %cst_59 = arith.constant 0.000000e+00 : f32
    %152 = vector.shape_cast %82 : vector<1x1xf32> to vector<1x1xf32>
    %153 = vector.broadcast %152 : vector<1x1xf32> to vector<2x128xf32>
    %154 = vector.broadcast %cst_59 : f32 to vector<2x128xf32>
    %155 = arith.select %151, %153, %154 : vector<2x128xi1>, vector<2x128xf32>
    %156 = vector.shape_cast %130 : vector<2x1xf32> to vector<2x1xf32>
    %157 = vector.broadcast %156 : vector<2x1xf32> to vector<2x128xf32>
    %158 = arith.select %149, %157, %155 : vector<2x128xi1>, vector<2x128xf32>
    %c0_60 = arith.constant 0 : index
    %c128_61 = arith.constant 128 : index
    %159 = vector.load %arg6[%c0_60, %c128_61] : memref<2x256xf32, #tpu.memory_space<vmem>>, vector<2x128xf32>
    tpu.vector_store %arg6[%c0_60, %c128_61], %158 {strides = array<i32>} : memref<2x256xf32, #tpu.memory_space<vmem>>, vector<2x128xf32>,
    return
  }
}

</mosaic_0001>

<bundles_post_ra>
// kernel: _classifier_forward_impl.1
= control target key start
LH: loop header
LB: loop body
LE: loop exit
PB: predicated region body
PF: predicated region fallthrough
CT: control target
= control target key end

     0   :  { %11 = vsyncpa [#allocation3], 0  ;;  %s5129_s0 = inlined_call_operand.vmem [shape: f32[10,1024], index: 0, kind: input, shape index: {}]   ;;  %s5130_s1 = inlined_call_operand.vmem [shape: f32[1,2048], index: 1, kind: input, shape index: {}]   ;;  %s5131_s2 = inlined_call_operand.hbm [shape: bf16[1024,512], index: 2, kind: input, shape index: {}]   ;;  %s5132_s3 = inlined_call_operand.hbm [shape: bf16[512,256], index: 3, kind: input, shape index: {}]   ;;  %s5133_s4 = inlined_call_operand.hbm [shape: bf16[256,640], index: 4, kind: input, shape index: {}]   ;;  %s5134_s5 = inlined_call_operand.vmem [shape: bf16[128,256], index: 5, kind: input, shape index: {}]   ;;  %s5135_s6 = inlined_call_operand.vmem [shape: f32[2,256], index: 6, kind: output, shape index: {}]  }
   0x1   :  { %12 = vsyncpa [#allocation5], 0  ;;  %s4826_s21 = smov [#allocation4]  }
   0x2   :  { %s34_s22 = sshll.u32 %s4826_s21, 4  ;;  %s35_s22 = int_to_ptr.vmem [resolvable:$true] %s34_s22 }
   0x3   :  { %s4770_s23 = scalar_lea.vmem %s35_s22, 8192  ;;  %p4775_p1 = scmp.lt.s32.totalorder %s35_s22, %s35_s22 }
   0x4   :  { %p4771_p0 = scmp.ne.s32.totalorder %s35_s22, %s4770_s23  ;;  %p4776_p2 = scmp.lt.s32.totalorder %s4770_s23, %s4770_s23 }
   0x6   :  { %p4777_p3 = por %p4776_p2, %p4775_p1 }
   0x8   :  { %p4778_p4 = pnand %p4777_p3, %p4771_p0 }
   0xa   :  { %4781 = shalt.err (!%p4778_p4)
}
   0xb   :  { %s4827_s24 = smov 128   ;;  %s4828_s25 = smov 8  }
   0xc   :  { %40 = dma.hbm_to_vmem [thread:$0]  %s5132_s3, 8192, %s35_s22, [#allocation5], %s4827_s24, %s4827_s24, %s4828_s25  }
   0xd   :  { %s4829_s28 = smov [#allocation2]  }
   0xe   :  { %s22_s29 = sshll.u32 %s4829_s28, 4  ;;  %s23_s29 = int_to_ptr.vmem [resolvable:$true] %s22_s29 }
   0xf   :  { %s4790_s30 = scalar_lea.vmem %s23_s29, 32768  ;;  %p4795_p6 = scmp.lt.s32.totalorder %s23_s29, %s23_s29 }
  0x10   :  { %p4791_p5 = scmp.ne.s32.totalorder %s23_s29, %s4790_s30  ;;  %p4796_p7 = scmp.lt.s32.totalorder %s4790_s30, %s4790_s30 }
  0x12   :  { %p4797_p8 = por %p4796_p7, %p4795_p6 }
  0x14   :  { %p4798_p9 = pnand %p4797_p8, %p4791_p5 }
  0x16   :  { %4801 = shalt.err (!%p4798_p9)
}
  0x17   :  { %s4830_s7 = smov 256   ;;  %s4831_s8 = smov 16  }
  0x18   :  { %28 = dma.hbm_to_vmem [thread:$0]  %s5131_s2, 32768, %s23_s29, [#allocation3], %s4830_s7, %s4830_s7, %s4831_s8  }
  0x19   :  { %s4832_s11 = smov [#allocation6]  }
  0x1a   :  { %s46_s12 = sshll.u32 %s4832_s11, 4  ;;  %s47_s12 = int_to_ptr.vmem [resolvable:$true] %s46_s12 }
  0x1b   :  { %s4810_s3 = scalar_lea.vmem %s47_s12, 10240  ;;  %p4815_p11 = scmp.lt.s32.totalorder %s47_s12, %s47_s12 }
  0x1c   :  { %p4811_p10 = scmp.ne.s32.totalorder %s47_s12, %s4810_s3  ;;  %p4816_p12 = scmp.lt.s32.totalorder %s4810_s3, %s4810_s3 }
  0x1e   :  { %p4817_p13 = por %p4816_p12, %p4815_p11 }
  0x20   :  { %p4818_p0 = pnand %p4817_p13, %p4811_p10 }
  0x22   :  { %4821 = shalt.err (!%p4818_p0)
}
  0x23   :  { %s4833_s13 = smov 320   ;;  %s4834_s14 = smov 20  }
  0x24   :  { %52 = dma.hbm_to_vmem [thread:$0]  %s5133_s4, 10240, %s47_s12, [#allocation5], %s4833_s13, %s4833_s13, %s4834_s14  }
  0x25   :  { %4822 = dma.done.wait [#allocation3], 32768  }
  0x26   :  { %4823 = vsyncadd [#allocation3], 4294934528 }
  0x27   :  { %4824 = dma.done.wait [#allocation5], 18432  }
  0x28   :  { %4825 = vsyncadd [#allocation5], 4294948864  ;;  %v4140_v0 = vld [vmem:[#allocation2 + $0xe4] ss:$16 sps:$4 sm:$0xff]   ;;  %v4144_v2 = vld [vmem:[#allocation2 + $0xe0] ss:$16 sps:$4 sm:$0xff]  }
  0x29   :  { %v4142_v1 = vld [vmem:[#allocation2 + $0x2e4] ss:$16 sps:$4 sm:$0xff]   ;;  %1647 = vmatprep.subr.bf16.mxu0 %v4140_v0  ;;  %v4145_v3 = vld [vmem:[#allocation2 + $0x2e0] ss:$16 sps:$4 sm:$0xff]   ;;  %v66_v46 = vld [vmem:[%s5129_s0 + $0x8] sm:$0xff]  ;;  %vm3127_vm2 = vcmask 1044480  }
  0x2a   :  { %1690 = vmatprep.subr.bf16.mxu1 %v4142_v1  ;;  %v4146_v4 = vld [vmem:[#allocation2 + $0xc4] ss:$16 sps:$4 sm:$0xff]   ;;  %1648 = vmatpush1.bf16.msra.mxu0 %v4144_v2  ;;  %v4150_v6 = vld [vmem:[#allocation2 + $0xc0] ss:$16 sps:$4 sm:$0xff]   ;;  %v74_v47 = vld [vmem:[%s5129_s0 + $0x48] sm:$0x3] }
  0x2b   :  { %1691 = vmatpush1.bf16.msra.mxu1 %v4145_v3  ;;  %v4148_v5 = vld [vmem:[#allocation2 + $0x2c4] ss:$16 sps:$4 sm:$0xff]   ;;  %1649 = vmatprep.subr.bf16.mxu0 %v4146_v4  ;;  %v4151_v7 = vld [vmem:[#allocation2 + $0x2c0] ss:$16 sps:$4 sm:$0xff]   ;;  %v68_v48 = vld [vmem:[%s5129_s0 + $0x18] sm:$0xff]  ;;  %v4895_v53 = vpack.c.bf16 %v74_v47, %v66_v46  ;;  %vm3123_vm4 = vcmask 80896  }
  0x2c   :  { %1692 = vmatprep.subr.bf16.mxu1 %v4148_v5  ;;  %v4152_v8 = vld [vmem:[#allocation2 + $0xa4] ss:$16 sps:$4 sm:$0xff]   ;;  %v4156_v10 = vld [vmem:[#allocation2 + $0xa0] ss:$16 sps:$4 sm:$0xff]   ;;  %v76_v49 = vld [vmem:[%s5129_s0 + $0x58] sm:$0x3] }
  0x2d   :  { %v4154_v9 = vld [vmem:[#allocation2 + $0x2a4] ss:$16 sps:$4 sm:$0xff]   ;;  %v4157_v11 = vld [vmem:[#allocation2 + $0x2a0] ss:$16 sps:$4 sm:$0xff]   ;;  %v4897_v54 = vpack.c.bf16 %v76_v49, %v68_v48  ;;  %1679 = vmatprep.mubr.bf16.mxu0 %v4895_v53  ;;  %v80_v46 = vld [vmem:[%s5129_s0 + $0x78] sm:$0x3] }
  0x2e   :  { %1650 = vmatpush1.bf16.msra.mxu0 %v4150_v6  ;;  %v4158_v12 = vld [vmem:[#allocation2 + $0x84] ss:$16 sps:$4 sm:$0xff]   ;;  %v4162_v14 = vld [vmem:[#allocation2 + $0x80] ss:$16 sps:$4 sm:$0xff]   ;;  %vm4837_vm5 = vmmov 0   ;;  %vm3014_vm6 = vcmask 1041408  }
  0x2f   :  { %1693 = vmatpush1.bf16.msra.mxu1 %v4151_v7  ;;  %1651 = vmatprep.subr.bf16.mxu0 %v4152_v8  ;;  %v4160_v13 = vld [vmem:[#allocation2 + $0x284] ss:$16 sps:$4 sm:$0xff]   ;;  %v4163_v15 = vld [vmem:[#allocation2 + $0x280] ss:$16 sps:$4 sm:$0xff]   ;;  %vm3087_vm7 = vcmask 1024   ;;  %vm3085_vm8 = vcmask 7168  }
  0x30   :  { %1694 = vmatprep.subr.bf16.mxu1 %v4154_v9  ;;  %v4164_v16 = vld [vmem:[#allocation2 + $0x64] ss:$16 sps:$4 sm:$0xff]   ;;  %v4168_v18 = vld [vmem:[#allocation2 + $0x60] ss:$16 sps:$4 sm:$0xff]   ;;  %1722 = vmatprep.mubr.bf16.mxu1 %v4897_v54  ;;  %vm3054_vm15 = vcmask 15360  }
  0x31   :  { %v4166_v17 = vld [vmem:[#allocation2 + $0x264] ss:$16 sps:$4 sm:$0xff]   ;;  %v4169_v19 = vld [vmem:[#allocation2 + $0x260] ss:$16 sps:$4 sm:$0xff]  }
  0x32   :  { %1652 = vmatpush1.bf16.msra.mxu0 %v4156_v10  ;;  %v4170_v20 = vld [vmem:[#allocation2 + $0x44] ss:$16 sps:$4 sm:$0xff]   ;;  %v4174_v22 = vld [vmem:[#allocation2 + $0x40] ss:$16 sps:$4 sm:$0xff]  }
  0x33   :  { %1695 = vmatpush1.bf16.msra.mxu1 %v4157_v11  ;;  %1653 = vmatprep.subr.bf16.mxu0 %v4158_v12  ;;  %v4172_v21 = vld [vmem:[#allocation2 + $0x244] ss:$16 sps:$4 sm:$0xff]   ;;  %v4175_v23 = vld [vmem:[#allocation2 + $0x240] ss:$16 sps:$4 sm:$0xff]  }
  0x34   :  { %1696 = vmatprep.subr.bf16.mxu1 %v4160_v13  ;;  %v4176_v24 = vld [vmem:[#allocation2 + $0x24] ss:$16 sps:$4 sm:$0xff]   ;;  %v4180_v26 = vld [vmem:[#allocation2 + $0x20] ss:$16 sps:$4 sm:$0xff]  }
  0x35   :  { %v4178_v25 = vld [vmem:[#allocation2 + $0x224] ss:$16 sps:$4 sm:$0xff]   ;;  %v4181_v27 = vld [vmem:[#allocation2 + $0x220] ss:$16 sps:$4 sm:$0xff]  }
  0x36   :  { %1654 = vmatpush1.bf16.msra.mxu0 %v4162_v14  ;;  %v4182_v28 = vld [vmem:[#allocation2 + $0x4] ss:$16 sps:$4 sm:$0xff]   ;;  %v4186_v30 = vld [vmem:[#allocation2] ss:$16 sps:$4 sm:$0xff]  }
  0x37   :  { %1697 = vmatpush1.bf16.msra.mxu1 %v4163_v15  ;;  %1655 = vmatprep.subr.bf16.mxu0 %v4164_v16  ;;  %v4184_v29 = vld [vmem:[#allocation2 + $0x204] ss:$16 sps:$4 sm:$0xff]   ;;  %v4187_v31 = vld [vmem:[#allocation2 + $0x200] ss:$16 sps:$4 sm:$0xff]  }
  0x38   :  { %1698 = vmatprep.subr.bf16.mxu1 %v4166_v17  ;;  %v4188_v32 = vld [vmem:[#allocation2 + $0x1e4] ss:$16 sps:$4 sm:$0xff]   ;;  %v4192_v34 = vld [vmem:[#allocation2 + $0x1e0] ss:$16 sps:$4 sm:$0xff]  }
  0x39   :  { %v4190_v33 = vld [vmem:[#allocation2 + $0x3e4] ss:$16 sps:$4 sm:$0xff]   ;;  %v4193_v35 = vld [vmem:[#allocation2 + $0x3e0] ss:$16 sps:$4 sm:$0xff]  }
  0x3a   :  { %1656 = vmatpush1.bf16.msra.mxu0 %v4168_v18  ;;  %v4194_v36 = vld [vmem:[#allocation2 + $0x1c4] ss:$16 sps:$4 sm:$0xff]   ;;  %v4198_v38 = vld [vmem:[#allocation2 + $0x1c0] ss:$16 sps:$4 sm:$0xff]  }
  0x3b   :  { %1699 = vmatpush1.bf16.msra.mxu1 %v4169_v19  ;;  %1657 = vmatprep.subr.bf16.mxu0 %v4170_v20  ;;  %v4196_v37 = vld [vmem:[#allocation2 + $0x3c4] ss:$16 sps:$4 sm:$0xff]   ;;  %v4199_v39 = vld [vmem:[#allocation2 + $0x3c0] ss:$16 sps:$4 sm:$0xff]  }
  0x3c   :  { %1700 = vmatprep.subr.bf16.mxu1 %v4172_v21  ;;  %v4200_v40 = vld [vmem:[#allocation2 + $0x1a4] ss:$16 sps:$4 sm:$0xff]   ;;  %v4204_v42 = vld [vmem:[#allocation2 + $0x1a0] ss:$16 sps:$4 sm:$0xff]  }
  0x3d   :  { %v4202_v41 = vld [vmem:[#allocation2 + $0x3a4] ss:$16 sps:$4 sm:$0xff]   ;;  %v4205_v43 = vld [vmem:[#allocation2 + $0x3a0] ss:$16 sps:$4 sm:$0xff]  }
  0x3e   :  { %1658 = vmatpush1.bf16.msra.mxu0 %v4174_v22  ;;  %v4206_v44 = vld [vmem:[#allocation2 + $0x184] ss:$16 sps:$4 sm:$0xff]   ;;  %v4210_v50 = vld [vmem:[#allocation2 + $0x180] ss:$16 sps:$4 sm:$0xff]  }
  0x3f   :  { %1701 = vmatpush1.bf16.msra.mxu1 %v4175_v23  ;;  %1659 = vmatprep.subr.bf16.mxu0 %v4176_v24  ;;  %v4208_v45 = vld [vmem:[#allocation2 + $0x384] ss:$16 sps:$4 sm:$0xff]   ;;  %v4211_v51 = vld [vmem:[#allocation2 + $0x380] ss:$16 sps:$4 sm:$0xff]  }
  0x40   :  { %1702 = vmatprep.subr.bf16.mxu1 %v4178_v25  ;;  %v4212_v52 = vld [vmem:[#allocation2 + $0x164] ss:$16 sps:$4 sm:$0xff]   ;;  %v4216_v56 = vld [vmem:[#allocation2 + $0x160] ss:$16 sps:$4 sm:$0xff]  }
  0x41   :  { %v4214_v55 = vld [vmem:[#allocation2 + $0x364] ss:$16 sps:$4 sm:$0xff]   ;;  %v4217_v57 = vld [vmem:[#allocation2 + $0x360] ss:$16 sps:$4 sm:$0xff]  }
  0x42   :  { %1660 = vmatpush1.bf16.msra.mxu0 %v4180_v26  ;;  %v4218_v58 = vld [vmem:[#allocation2 + $0x144] ss:$16 sps:$4 sm:$0xff]   ;;  %v4222_v60 = vld [vmem:[#allocation2 + $0x140] ss:$16 sps:$4 sm:$0xff]  }
  0x43   :  { %1703 = vmatpush1.bf16.msra.mxu1 %v4181_v27  ;;  %1661 = vmatprep.subr.bf16.mxu0 %v4182_v28  ;;  %v4220_v59 = vld [vmem:[#allocation2 + $0x344] ss:$16 sps:$4 sm:$0xff]   ;;  %v4223_v61 = vld [vmem:[#allocation2 + $0x340] ss:$16 sps:$4 sm:$0xff]  }
  0x44   :  { %1704 = vmatprep.subr.bf16.mxu1 %v4184_v29  ;;  %v4224_v62 = vld [vmem:[#allocation2 + $0x124] ss:$16 sps:$4 sm:$0xff]   ;;  %v4228_v0 = vld [vmem:[#allocation2 + $0x120] ss:$16 sps:$4 sm:$0xff]  }
  0x45   :  { %v4226_v63 = vld [vmem:[#allocation2 + $0x324] ss:$16 sps:$4 sm:$0xff]   ;;  %v4229_v1 = vld [vmem:[#allocation2 + $0x320] ss:$16 sps:$4 sm:$0xff]  }
  0x46   :  { %1662 = vmatpush1.bf16.msra.mxu0 %v4186_v30  ;;  %v4230_v2 = vld [vmem:[#allocation2 + $0x104] ss:$16 sps:$4 sm:$0xff]   ;;  %v4234_v4 = vld [vmem:[#allocation2 + $0x100] ss:$16 sps:$4 sm:$0xff]  }
  0x47   :  { %1705 = vmatpush1.bf16.msra.mxu1 %v4187_v31  ;;  %1663 = vmatprep.subr.bf16.mxu0 %v4188_v32  ;;  %v4232_v3 = vld [vmem:[#allocation2 + $0x304] ss:$16 sps:$4 sm:$0xff]   ;;  %v4235_v5 = vld [vmem:[#allocation2 + $0x300] ss:$16 sps:$4 sm:$0xff]  }
  0x48   :  { %1706 = vmatprep.subr.bf16.mxu1 %v4190_v33  ;;  %v65_v6 = vld [vmem:[%s5129_s0] sm:$0xff]  ;;  %v67_v8 = vld [vmem:[%s5129_s0 + $0x10] sm:$0xff] }
  0x49   :  { %v73_v7 = vld [vmem:[%s5129_s0 + $0x40] sm:$0x3]  ;;  %v75_v9 = vld [vmem:[%s5129_s0 + $0x50] sm:$0x3]  ;;  %v4238_v10 = vld [vmem:[#allocation2 + $0x4e4] ss:$16 sps:$4 sm:$0xff]  }
  0x4a   :  { %1664 = vmatpush2.bf16.msra.mxu0 %v4192_v34  ;;  %v4241_v11 = vld [vmem:[#allocation2 + $0x6e4] ss:$16 sps:$4 sm:$0xff]   ;;  %v4913_v12 = vpack.c.bf16 %v73_v7, %v65_v6  ;;  %v4915_v13 = vpack.c.bf16 %v75_v9, %v67_v8  ;;  %v4236_v14 = vld [vmem:[#allocation2 + $0x4e0] ss:$16 sps:$4 sm:$0xff]  }
  0x4b   :  { %1707 = vmatpush2.bf16.msra.mxu1 %v4193_v35  ;;  %1665 = vmatprep.subr.bf16.mxu0 %v4194_v36  ;;  %v4239_v15 = vld [vmem:[#allocation2 + $0x6e0] ss:$16 sps:$4 sm:$0xff]   ;;  %v4244_v16 = vld [vmem:[#allocation2 + $0x4c4] ss:$16 sps:$4 sm:$0xff]  }
  0x4c   :  { %1708 = vmatprep.subr.bf16.mxu1 %v4196_v37  ;;  %v4247_v17 = vld [vmem:[#allocation2 + $0x6c4] ss:$16 sps:$4 sm:$0xff]   ;;  %v4242_v18 = vld [vmem:[#allocation2 + $0x4c0] ss:$16 sps:$4 sm:$0xff]  }
  0x4d   :  { %v4245_v19 = vld [vmem:[#allocation2 + $0x6c0] ss:$16 sps:$4 sm:$0xff]   ;;  %v4250_v20 = vld [vmem:[#allocation2 + $0x4a4] ss:$16 sps:$4 sm:$0xff]  }
  0x4e   :  { %1666 = vmatpush2.bf16.msra.mxu0 %v4198_v38  ;;  %v4253_v21 = vld [vmem:[#allocation2 + $0x6a4] ss:$16 sps:$4 sm:$0xff]   ;;  %v4248_v22 = vld [vmem:[#allocation2 + $0x4a0] ss:$16 sps:$4 sm:$0xff]  }
  0x4f   :  { %1709 = vmatpush2.bf16.msra.mxu1 %v4199_v39  ;;  %1667 = vmatprep.subr.bf16.mxu0 %v4200_v40  ;;  %v4251_v23 = vld [vmem:[#allocation2 + $0x6a0] ss:$16 sps:$4 sm:$0xff]   ;;  %v4256_v24 = vld [vmem:[#allocation2 + $0x484] ss:$16 sps:$4 sm:$0xff]   ;;  %v70_v40 = vld [vmem:[%s5129_s0 + $0x28] sm:$0xff] }
  0x50   :  { %1710 = vmatprep.subr.bf16.mxu1 %v4202_v41  ;;  %v4259_v25 = vld [vmem:[#allocation2 + $0x684] ss:$16 sps:$4 sm:$0xff]   ;;  %v4254_v26 = vld [vmem:[#allocation2 + $0x480] ss:$16 sps:$4 sm:$0xff]   ;;  %v78_v41 = vld [vmem:[%s5129_s0 + $0x68] sm:$0x3] }
  0x51   :  { %v4257_v27 = vld [vmem:[#allocation2 + $0x680] ss:$16 sps:$4 sm:$0xff]   ;;  %v4262_v28 = vld [vmem:[#allocation2 + $0x464] ss:$16 sps:$4 sm:$0xff]  }
  0x52   :  { %1668 = vmatpush2.bf16.msra.mxu0 %v4204_v42  ;;  %v4265_v29 = vld [vmem:[#allocation2 + $0x664] ss:$16 sps:$4 sm:$0xff]   ;;  %v4260_v30 = vld [vmem:[#allocation2 + $0x460] ss:$16 sps:$4 sm:$0xff]   ;;  %v72_v42 = vld [vmem:[%s5129_s0 + $0x38] sm:$0xff] }
  0x53   :  { %1711 = vmatpush2.bf16.msra.mxu1 %v4205_v43  ;;  %1669 = vmatprep.subr.bf16.mxu0 %v4206_v44  ;;  %v4263_v31 = vld [vmem:[#allocation2 + $0x660] ss:$16 sps:$4 sm:$0xff]   ;;  %v4268_v32 = vld [vmem:[#allocation2 + $0x444] ss:$16 sps:$4 sm:$0xff]   ;;  %v4933_v47 = vpack.c.bf16 %v80_v46, %v72_v42  ;;  %v4350_v42 = vld [vmem:[#allocation2 + $0x88] ss:$16 sps:$4 sm:$0xff]  }
  0x54   :  { %1712 = vmatprep.subr.bf16.mxu1 %v4208_v45  ;;  %v4271_v33 = vld [vmem:[#allocation2 + $0x644] ss:$16 sps:$4 sm:$0xff]   ;;  %v4266_v34 = vld [vmem:[#allocation2 + $0x440] ss:$16 sps:$4 sm:$0xff]   ;;  %v4928_v45 = vpack.c.bf16 %v78_v41, %v70_v40  ;;  %v4352_v40 = vld [vmem:[#allocation2 + $0x8c] ss:$16 sps:$4 sm:$0xff]  }
  0x55   :  { %v4269_v35 = vld [vmem:[#allocation2 + $0x640] ss:$16 sps:$4 sm:$0xff]   ;;  %v4274_v36 = vld [vmem:[#allocation2 + $0x424] ss:$16 sps:$4 sm:$0xff]   ;;  %v4355_v41 = vld [vmem:[#allocation2 + $0x28c] ss:$16 sps:$4 sm:$0xff]  }
  0x56   :  { %1670 = vmatpush2.bf16.msra.mxu0 %v4210_v50  ;;  %v4277_v37 = vld [vmem:[#allocation2 + $0x624] ss:$16 sps:$4 sm:$0xff]   ;;  %v4272_v38 = vld [vmem:[#allocation2 + $0x420] ss:$16 sps:$4 sm:$0xff]   ;;  %v4361_v46 = vld [vmem:[#allocation2 + $0x26c] ss:$16 sps:$4 sm:$0xff]  }
  0x57   :  { %1713 = vmatpush2.bf16.msra.mxu1 %v4211_v51  ;;  %1671 = vmatprep.subr.bf16.mxu0 %v4212_v52  ;;  %v4275_v39 = vld [vmem:[#allocation2 + $0x620] ss:$16 sps:$4 sm:$0xff]   ;;  %v4280_v43 = vld [vmem:[#allocation2 + $0x404] ss:$16 sps:$4 sm:$0xff]  }
  0x58   :  { %1714 = vmatprep.subr.bf16.mxu1 %v4214_v55  ;;  %v4283_v44 = vld [vmem:[#allocation2 + $0x604] ss:$16 sps:$4 sm:$0xff]   ;;  %v4278_v48 = vld [vmem:[#allocation2 + $0x400] ss:$16 sps:$4 sm:$0xff]  }
  0x59   :  { %v4281_v49 = vld [vmem:[#allocation2 + $0x600] ss:$16 sps:$4 sm:$0xff]   ;;  %v4286_v50 = vld [vmem:[#allocation2 + $0x5e4] ss:$16 sps:$4 sm:$0xff]  }
  0x5a   :  { %1672 = vmatpush2.bf16.msra.mxu0 %v4216_v56  ;;  %v4289_v51 = vld [vmem:[#allocation2 + $0x7e4] ss:$16 sps:$4 sm:$0xff]   ;;  %v4284_v52 = vld [vmem:[#allocation2 + $0x5e0] ss:$16 sps:$4 sm:$0xff]  }
  0x5b   :  { %1715 = vmatpush2.bf16.msra.mxu1 %v4217_v57  ;;  %1673 = vmatprep.subr.bf16.mxu0 %v4218_v58  ;;  %v4287_v55 = vld [vmem:[#allocation2 + $0x7e0] ss:$16 sps:$4 sm:$0xff]   ;;  %v4292_v56 = vld [vmem:[#allocation2 + $0x5c4] ss:$16 sps:$4 sm:$0xff]  }
  0x5c   :  { %1716 = vmatprep.subr.bf16.mxu1 %v4220_v59  ;;  %v4295_v57 = vld [vmem:[#allocation2 + $0x7c4] ss:$16 sps:$4 sm:$0xff]   ;;  %v4290_v58 = vld [vmem:[#allocation2 + $0x5c0] ss:$16 sps:$4 sm:$0xff]  }
  0x5d   :  { %v4293_v59 = vld [vmem:[#allocation2 + $0x7c0] ss:$16 sps:$4 sm:$0xff]   ;;  %v4316_v8 = vld [vmem:[#allocation2 + $0x544] ss:$16 sps:$4 sm:$0xff]  }
  0x5e   :  { %1674 = vmatpush2.bf16.msra.mxu0 %v4222_v60  ;;  %v4298_v60 = vld [vmem:[#allocation2 + $0x5a4] ss:$16 sps:$4 sm:$0xff]   ;;  %v4308_v6 = vld [vmem:[#allocation2 + $0x560] ss:$16 sps:$4 sm:$0xff]  }
  0x5f   :  { %1717 = vmatpush2.bf16.msra.mxu1 %v4223_v61  ;;  %1675 = vmatprep.subr.bf16.mxu0 %v4224_v62  ;;  %v4301_v61 = vld [vmem:[#allocation2 + $0x7a4] ss:$16 sps:$4 sm:$0xff]   ;;  %v4296_v62 = vld [vmem:[#allocation2 + $0x5a0] ss:$16 sps:$4 sm:$0xff]  }
  0x60   :  { %1718 = vmatprep.subr.bf16.mxu1 %v4226_v63  ;;  %v4299_v63 = vld [vmem:[#allocation2 + $0x7a0] ss:$16 sps:$4 sm:$0xff]   ;;  %v4319_v9 = vld [vmem:[#allocation2 + $0x744] ss:$16 sps:$4 sm:$0xff]  }
  0x61   :  { %v4311_v7 = vld [vmem:[#allocation2 + $0x760] ss:$16 sps:$4 sm:$0xff]  }
  0x62   :  { %1676 = vmatpush2.bf16.msra.mxu0 %v4228_v0  ;;  %v4304_v0 = vld [vmem:[#allocation2 + $0x584] ss:$16 sps:$4 sm:$0xff]  }
  0x63   :  { %1719 = vmatpush2.bf16.msra.mxu1 %v4229_v1  ;;  %1677 = vmatprep.subr.bf16.mxu0 %v4230_v2  ;;  %v4307_v1 = vld [vmem:[#allocation2 + $0x784] ss:$16 sps:$4 sm:$0xff]   ;;  %v4302_v2 = vld [vmem:[#allocation2 + $0x580] ss:$16 sps:$4 sm:$0xff]  }
  0x64   :  { %1720 = vmatprep.subr.bf16.mxu1 %v4232_v3  ;;  %v4305_v3 = vld [vmem:[#allocation2 + $0x780] ss:$16 sps:$4 sm:$0xff]  }
  0x66   :  { %1678 = vmatpush2.bf16.msra.mxu0 %v4234_v4  ;;  %v4310_v4 = vld [vmem:[#allocation2 + $0x564] ss:$16 sps:$4 sm:$0xff]  }
  0x67   :  { %1721 = vmatpush2.bf16.msra.mxu1 %v4235_v5  ;;  %1733 = vmatprep.subr.bf16.mxu0 %v4238_v10  ;;  %v4313_v5 = vld [vmem:[#allocation2 + $0x764] ss:$16 sps:$4 sm:$0xff]   ;;  %v4314_v10 = vld [vmem:[#allocation2 + $0x540] ss:$16 sps:$4 sm:$0xff]  }
  0x68   :  { %1776 = vmatprep.subr.bf16.mxu1 %v4241_v11  ;;  %v4317_v11 = vld [vmem:[#allocation2 + $0x740] ss:$16 sps:$4 sm:$0xff]  }
  0x69   :  { %1680 = vmatmul.mubr.bf16.vlgmr.msra.gmra.mxu0 %v4913_v12 }
  0x6a   :  { %1723 = vmatmul.mubr.bf16.vlgmr.msra.gmra.mxu1 %v4915_v13  ;;  %1734 = vmatpush1.bf16.msra.mxu0 %v4236_v14  ;;  %v4322_v14 = vld [vmem:[#allocation2 + $0x524] ss:$16 sps:$4 sm:$0xff]  }
  0x6b   :  { %1777 = vmatpush1.bf16.msra.mxu1 %v4239_v15  ;;  %1735 = vmatprep.subr.bf16.mxu0 %v4244_v16  ;;  %v4325_v15 = vld [vmem:[#allocation2 + $0x724] ss:$16 sps:$4 sm:$0xff]   ;;  %v4320_v16 = vld [vmem:[#allocation2 + $0x520] ss:$16 sps:$4 sm:$0xff]  }
  0x6c   :  { %1778 = vmatprep.subr.bf16.mxu1 %v4247_v17  ;;  %1765 = vmatprep.mubr.bf16.mxu0 %v4928_v45  ;;  %v4323_v17 = vld [vmem:[#allocation2 + $0x720] ss:$16 sps:$4 sm:$0xff]  }
  0x6d   :  { %1808 = vmatprep.mubr.bf16.mxu1 %v4933_v47 }
  0x6e   :  { %1736 = vmatpush1.bf16.msra.mxu0 %v4242_v18  ;;  %v4328_v18 = vld [vmem:[#allocation2 + $0x504] ss:$16 sps:$4 sm:$0xff]  }
  0x6f   :  { %1779 = vmatpush1.bf16.msra.mxu1 %v4245_v19  ;;  %1737 = vmatprep.subr.bf16.mxu0 %v4250_v20  ;;  %v4331_v19 = vld [vmem:[#allocation2 + $0x704] ss:$16 sps:$4 sm:$0xff]   ;;  %v4326_v20 = vld [vmem:[#allocation2 + $0x500] ss:$16 sps:$4 sm:$0xff]  }
  0x70   :  { %1780 = vmatprep.subr.bf16.mxu1 %v4253_v21  ;;  %v4329_v21 = vld [vmem:[#allocation2 + $0x700] ss:$16 sps:$4 sm:$0xff]  }
  0x72   :  { %1738 = vmatpush1.bf16.msra.mxu0 %v4248_v22  ;;  %v69_v22 = vld [vmem:[%s5129_s0 + $0x20] sm:$0xff] }
  0x73   :  { %1781 = vmatpush1.bf16.msra.mxu1 %v4251_v23  ;;  %1739 = vmatprep.subr.bf16.mxu0 %v4256_v24  ;;  %v77_v23 = vld [vmem:[%s5129_s0 + $0x60] sm:$0x3]  ;;  %v71_v24 = vld [vmem:[%s5129_s0 + $0x30] sm:$0xff] }
  0x74   :  { %1782 = vmatprep.subr.bf16.mxu1 %v4259_v25  ;;  %v79_v25 = vld [vmem:[%s5129_s0 + $0x70] sm:$0x3] }
  0x76   :  { %1740 = vmatpush1.bf16.msra.mxu0 %v4254_v26  ;;  %v4334_v26 = vld [vmem:[#allocation2 + $0xec] ss:$16 sps:$4 sm:$0xff]  }
  0x77   :  { %1783 = vmatpush1.bf16.msra.mxu1 %v4257_v27  ;;  %1741 = vmatprep.subr.bf16.mxu0 %v4262_v28  ;;  %v4337_v27 = vld [vmem:[#allocation2 + $0x2ec] ss:$16 sps:$4 sm:$0xff]   ;;  %v4949_v28 = vpack.c.bf16 %v77_v23, %v69_v22  ;;  %v4410_v22 = vld [vmem:[#allocation2 + $0x148] ss:$16 sps:$4 sm:$0xff]  }
  0x78   :  { %1784 = vmatprep.subr.bf16.mxu1 %v4265_v29  ;;  %v4951_v29 = vpack.c.bf16 %v79_v25, %v71_v24  ;;  %v4413_v23 = vld [vmem:[#allocation2 + $0x348] ss:$16 sps:$4 sm:$0xff]   ;;  %v4418_v24 = vld [vmem:[#allocation2 + $0x12c] ss:$16 sps:$4 sm:$0xff]  }
  0x79   :  { %v4421_v25 = vld [vmem:[#allocation2 + $0x32c] ss:$16 sps:$4 sm:$0xff]  }
  0x7a   :  { %1742 = vmatpush1.bf16.msra.mxu0 %v4260_v30  ;;  %v4332_v30 = vld [vmem:[#allocation2 + $0xe8] ss:$16 sps:$4 sm:$0xff]  }
  0x7b   :  { %1785 = vmatpush1.bf16.msra.mxu1 %v4263_v31  ;;  %1743 = vmatprep.subr.bf16.mxu0 %v4268_v32  ;;  %v4335_v31 = vld [vmem:[#allocation2 + $0x2e8] ss:$16 sps:$4 sm:$0xff]   ;;  %v4340_v32 = vld [vmem:[#allocation2 + $0xcc] ss:$16 sps:$4 sm:$0xff]  }
  0x7c   :  { %1786 = vmatprep.subr.bf16.mxu1 %v4271_v33  ;;  %v4343_v33 = vld [vmem:[#allocation2 + $0x2cc] ss:$16 sps:$4 sm:$0xff]  }
  0x7e   :  { %1744 = vmatpush1.bf16.msra.mxu0 %v4266_v34  ;;  %v4338_v34 = vld [vmem:[#allocation2 + $0xc8] ss:$16 sps:$4 sm:$0xff]  }
  0x7f   :  { %1787 = vmatpush1.bf16.msra.mxu1 %v4269_v35  ;;  %1745 = vmatprep.subr.bf16.mxu0 %v4274_v36  ;;  %v4341_v35 = vld [vmem:[#allocation2 + $0x2c8] ss:$16 sps:$4 sm:$0xff]   ;;  %v4346_v36 = vld [vmem:[#allocation2 + $0xac] ss:$16 sps:$4 sm:$0xff]  }
  0x80   :  { %1788 = vmatprep.subr.bf16.mxu1 %v4277_v37  ;;  %v4349_v37 = vld [vmem:[#allocation2 + $0x2ac] ss:$16 sps:$4 sm:$0xff]  }
  0x82   :  { %1746 = vmatpush1.bf16.msra.mxu0 %v4272_v38  ;;  %v4344_v38 = vld [vmem:[#allocation2 + $0xa8] ss:$16 sps:$4 sm:$0xff]  }
  0x83   :  { %1789 = vmatpush1.bf16.msra.mxu1 %v4275_v39  ;;  %1747 = vmatprep.subr.bf16.mxu0 %v4280_v43  ;;  %v4347_v39 = vld [vmem:[#allocation2 + $0x2a8] ss:$16 sps:$4 sm:$0xff]  }
  0x84   :  { %1790 = vmatprep.subr.bf16.mxu1 %v4283_v44  ;;  %v4353_v43 = vld [vmem:[#allocation2 + $0x288] ss:$16 sps:$4 sm:$0xff]   ;;  %v4358_v44 = vld [vmem:[#allocation2 + $0x6c] ss:$16 sps:$4 sm:$0xff]  }
  0x86   :  { %1748 = vmatpush1.bf16.msra.mxu0 %v4278_v48  ;;  %v4356_v48 = vld [vmem:[#allocation2 + $0x68] ss:$16 sps:$4 sm:$0xff]  }
  0x87   :  { %1791 = vmatpush1.bf16.msra.mxu1 %v4281_v49  ;;  %1749 = vmatprep.subr.bf16.mxu0 %v4286_v50  ;;  %v4367_v49 = vld [vmem:[#allocation2 + $0x24c] ss:$16 sps:$4 sm:$0xff]   ;;  %v4362_v50 = vld [vmem:[#allocation2 + $0x48] ss:$16 sps:$4 sm:$0xff]  }
  0x88   :  { %1792 = vmatprep.subr.bf16.mxu1 %v4289_v51  ;;  %v4365_v51 = vld [vmem:[#allocation2 + $0x248] ss:$16 sps:$4 sm:$0xff]  }
  0x8a   :  { %1750 = vmatpush2.bf16.msra.mxu0 %v4284_v52  ;;  %v4370_v52 = vld [vmem:[#allocation2 + $0x2c] ss:$16 sps:$4 sm:$0xff]  }
  0x8b   :  { %1793 = vmatpush2.bf16.msra.mxu1 %v4287_v55  ;;  %1751 = vmatprep.subr.bf16.mxu0 %v4292_v56  ;;  %v4373_v55 = vld [vmem:[#allocation2 + $0x22c] ss:$16 sps:$4 sm:$0xff]   ;;  %v4368_v56 = vld [vmem:[#allocation2 + $0x28] ss:$16 sps:$4 sm:$0xff]  }
  0x8c   :  { %1794 = vmatprep.subr.bf16.mxu1 %v4295_v57  ;;  %v4371_v57 = vld [vmem:[#allocation2 + $0x228] ss:$16 sps:$4 sm:$0xff]  }
  0x8e   :  { %1752 = vmatpush2.bf16.msra.mxu0 %v4290_v58  ;;  %v4376_v58 = vld [vmem:[#allocation2 + $0xc] ss:$16 sps:$4 sm:$0xff]  }
  0x8f   :  { %1795 = vmatpush2.bf16.msra.mxu1 %v4293_v59  ;;  %1753 = vmatprep.subr.bf16.mxu0 %v4298_v60  ;;  %v4379_v59 = vld [vmem:[#allocation2 + $0x20c] ss:$16 sps:$4 sm:$0xff]   ;;  %v4374_v60 = vld [vmem:[#allocation2 + $0x8] ss:$16 sps:$4 sm:$0xff]  }
  0x90   :  { %1796 = vmatprep.subr.bf16.mxu1 %v4301_v61  ;;  %v4377_v61 = vld [vmem:[#allocation2 + $0x208] ss:$16 sps:$4 sm:$0xff]  }
  0x92   :  { %1754 = vmatpush2.bf16.msra.mxu0 %v4296_v62  ;;  %v4382_v62 = vld [vmem:[#allocation2 + $0x1ec] ss:$16 sps:$4 sm:$0xff]  }
  0x93   :  { %1797 = vmatpush2.bf16.msra.mxu1 %v4299_v63  ;;  %1755 = vmatprep.subr.bf16.mxu0 %v4304_v0  ;;  %v4385_v63 = vld [vmem:[#allocation2 + $0x3ec] ss:$16 sps:$4 sm:$0xff]   ;;  %v4380_v0 = vld [vmem:[#allocation2 + $0x1e8] ss:$16 sps:$4 sm:$0xff]  }
  0x94   :  { %1798 = vmatprep.subr.bf16.mxu1 %v4307_v1  ;;  %v4383_v1 = vld [vmem:[#allocation2 + $0x3e8] ss:$16 sps:$4 sm:$0xff]  }
  0x96   :  { %1756 = vmatpush2.bf16.msra.mxu0 %v4302_v2  ;;  %v4388_v2 = vld [vmem:[#allocation2 + $0x1cc] ss:$16 sps:$4 sm:$0xff]  }
  0x97   :  { %1799 = vmatpush2.bf16.msra.mxu1 %v4305_v3  ;;  %1757 = vmatprep.subr.bf16.mxu0 %v4310_v4  ;;  %v4391_v3 = vld [vmem:[#allocation2 + $0x3cc] ss:$16 sps:$4 sm:$0xff]   ;;  %v4386_v4 = vld [vmem:[#allocation2 + $0x1c8] ss:$16 sps:$4 sm:$0xff]  }
  0x98   :  { %1800 = vmatprep.subr.bf16.mxu1 %v4313_v5  ;;  %v4389_v5 = vld [vmem:[#allocation2 + $0x3c8] ss:$16 sps:$4 sm:$0xff]  }
  0x9a   :  { %1758 = vmatpush2.bf16.msra.mxu0 %v4308_v6  ;;  %v4394_v6 = vld [vmem:[#allocation2 + $0x1ac] ss:$16 sps:$4 sm:$0xff]  }
  0x9b   :  { %1801 = vmatpush2.bf16.msra.mxu1 %v4311_v7  ;;  %1759 = vmatprep.subr.bf16.mxu0 %v4316_v8  ;;  %v4397_v7 = vld [vmem:[#allocation2 + $0x3ac] ss:$16 sps:$4 sm:$0xff]   ;;  %v4392_v8 = vld [vmem:[#allocation2 + $0x1a8] ss:$16 sps:$4 sm:$0xff]  }
  0x9c   :  { %1802 = vmatprep.subr.bf16.mxu1 %v4319_v9  ;;  %v4395_v9 = vld [vmem:[#allocation2 + $0x3a8] ss:$16 sps:$4 sm:$0xff]  }
  0x9e   :  { %1760 = vmatpush2.bf16.msra.mxu0 %v4314_v10  ;;  %v4400_v10 = vld [vmem:[#allocation2 + $0x18c] ss:$16 sps:$4 sm:$0xff]  }
  0x9f   :  { %1803 = vmatpush2.bf16.msra.mxu1 %v4317_v11  ;;  %1761 = vmatprep.subr.bf16.mxu0 %v4322_v14  ;;  %v4403_v11 = vld [vmem:[#allocation2 + $0x38c] ss:$16 sps:$4 sm:$0xff]   ;;  %v4398_v14 = vld [vmem:[#allocation2 + $0x188] ss:$16 sps:$4 sm:$0xff]  }
  0xa0   :  { %1804 = vmatprep.subr.bf16.mxu1 %v4325_v15  ;;  %v4401_v15 = vld [vmem:[#allocation2 + $0x388] ss:$16 sps:$4 sm:$0xff]  }
  0xa2   :  { %1762 = vmatpush2.bf16.msra.mxu0 %v4320_v16  ;;  %v4406_v16 = vld [vmem:[#allocation2 + $0x16c] ss:$16 sps:$4 sm:$0xff]  }
  0xa3   :  { %1805 = vmatpush2.bf16.msra.mxu1 %v4323_v17  ;;  %1763 = vmatprep.subr.bf16.mxu0 %v4328_v18  ;;  %v4409_v17 = vld [vmem:[#allocation2 + $0x36c] ss:$16 sps:$4 sm:$0xff]   ;;  %v4404_v18 = vld [vmem:[#allocation2 + $0x168] ss:$16 sps:$4 sm:$0xff]  }
  0xa4   :  { %1806 = vmatprep.subr.bf16.mxu1 %v4331_v19  ;;  %v4407_v19 = vld [vmem:[#allocation2 + $0x368] ss:$16 sps:$4 sm:$0xff]  }
  0xa6   :  { %1764 = vmatpush2.bf16.msra.mxu0 %v4326_v20  ;;  %v4412_v20 = vld [vmem:[#allocation2 + $0x14c] ss:$16 sps:$4 sm:$0xff]  }
  0xa7   :  { %1807 = vmatpush2.bf16.msra.mxu1 %v4329_v21  ;;  %1819 = vmatprep.subr.bf16.mxu0 %v4334_v26  ;;  %v4415_v21 = vld [vmem:[#allocation2 + $0x34c] ss:$16 sps:$4 sm:$0xff]   ;;  %v4416_v26 = vld [vmem:[#allocation2 + $0x128] ss:$16 sps:$4 sm:$0xff]  }
  0xa8   :  { %1862 = vmatprep.subr.bf16.mxu1 %v4337_v27  ;;  %v4419_v27 = vld [vmem:[#allocation2 + $0x328] ss:$16 sps:$4 sm:$0xff]  }
  0xa9   :  { %1766 = vmatmul.mubr.bf16.vlgmr.msra.gmra.mxu0 %v4949_v28 }
  0xaa   :  { %1809 = vmatmul.mubr.bf16.vlgmr.msra.gmra.mxu1 %v4951_v29  ;;  %1820 = vmatpush1.bf16.msra.mxu0 %v4332_v30  ;;  %v4424_v30 = vld [vmem:[#allocation2 + $0x10c] ss:$16 sps:$4 sm:$0xff]  }
  0xab   :  { %1863 = vmatpush1.bf16.msra.mxu1 %v4335_v31  ;;  %1821 = vmatprep.subr.bf16.mxu0 %v4340_v32  ;;  %v4427_v31 = vld [vmem:[#allocation2 + $0x30c] ss:$16 sps:$4 sm:$0xff]   ;;  %v4422_v32 = vld [vmem:[#allocation2 + $0x108] ss:$16 sps:$4 sm:$0xff]  }
  0xac   :  { %1864 = vmatprep.subr.bf16.mxu1 %v4343_v33  ;;  %1851 = vmatprep.mubr.bf16.mxu0 %v4895_v53  ;;  %v4359_v53 = vld [vmem:[#allocation2 + $0x268] ss:$16 sps:$4 sm:$0xff]  }
  0xad   :  { %1894 = vmatprep.mubr.bf16.mxu1 %v4897_v54  ;;  %v4364_v54 = vld [vmem:[#allocation2 + $0x4c] ss:$16 sps:$4 sm:$0xff]   ;;  %v4425_v33 = vld [vmem:[#allocation2 + $0x308] ss:$16 sps:$4 sm:$0xff]  }
  0xae   :  { %1822 = vmatpush1.bf16.msra.mxu0 %v4338_v34  ;;  %v4430_v34 = vld [vmem:[#allocation2 + $0x4ec] ss:$16 sps:$4 sm:$0xff]  }
  0xaf   :  { %1865 = vmatpush1.bf16.msra.mxu1 %v4341_v35  ;;  %1823 = vmatprep.subr.bf16.mxu0 %v4346_v36  ;;  %v4433_v35 = vld [vmem:[#allocation2 + $0x6ec] ss:$16 sps:$4 sm:$0xff]   ;;  %v4428_v36 = vld [vmem:[#allocation2 + $0x4e8] ss:$16 sps:$4 sm:$0xff]  }
  0xb0   :  { %1866 = vmatprep.subr.bf16.mxu1 %v4349_v37  ;;  %v4431_v37 = vld [vmem:[#allocation2 + $0x6e8] ss:$16 sps:$4 sm:$0xff]  }
  0xb2   :  { %1824 = vmatpush1.bf16.msra.mxu0 %v4344_v38  ;;  %v4436_v38 = vld [vmem:[#allocation2 + $0x4cc] ss:$16 sps:$4 sm:$0xff]  }
  0xb3   :  { %1867 = vmatpush1.bf16.msra.mxu1 %v4347_v39  ;;  %1825 = vmatprep.subr.bf16.mxu0 %v4352_v40  ;;  %v4439_v39 = vld [vmem:[#allocation2 + $0x6cc] ss:$16 sps:$4 sm:$0xff]   ;;  %v4434_v40 = vld [vmem:[#allocation2 + $0x4c8] ss:$16 sps:$4 sm:$0xff]  }
  0xb4   :  { %1868 = vmatprep.subr.bf16.mxu1 %v4355_v41  ;;  %v4437_v41 = vld [vmem:[#allocation2 + $0x6c8] ss:$16 sps:$4 sm:$0xff]  }
  0xb6   :  { %1826 = vmatpush1.bf16.msra.mxu0 %v4350_v42  ;;  %v4442_v42 = vld [vmem:[#allocation2 + $0x4ac] ss:$16 sps:$4 sm:$0xff]  }
  0xb7   :  { %1869 = vmatpush1.bf16.msra.mxu1 %v4353_v43  ;;  %1827 = vmatprep.subr.bf16.mxu0 %v4358_v44  ;;  %v4445_v43 = vld [vmem:[#allocation2 + $0x6ac] ss:$16 sps:$4 sm:$0xff]   ;;  %v4440_v44 = vld [vmem:[#allocation2 + $0x4a8] ss:$16 sps:$4 sm:$0xff]  }
  0xb8   :  { %1870 = vmatprep.subr.bf16.mxu1 %v4361_v46  ;;  %v4443_v46 = vld [vmem:[#allocation2 + $0x6a8] ss:$16 sps:$4 sm:$0xff]  }
  0xba   :  { %1828 = vmatpush1.bf16.msra.mxu0 %v4356_v48  ;;  %v4448_v48 = vld [vmem:[#allocation2 + $0x48c] ss:$16 sps:$4 sm:$0xff]  }
  0xbb   :  { %1871 = vmatpush1.bf16.msra.mxu1 %v4359_v53  ;;  %1829 = vmatprep.subr.bf16.mxu0 %v4364_v54  ;;  %v4446_v53 = vld [vmem:[#allocation2 + $0x488] ss:$16 sps:$4 sm:$0xff]   ;;  %v4454_v54 = vld [vmem:[#allocation2 + $0x46c] ss:$16 sps:$4 sm:$0xff]  }
  0xbc   :  { %1872 = vmatprep.subr.bf16.mxu1 %v4367_v49  ;;  %v4457_v49 = vld [vmem:[#allocation2 + $0x66c] ss:$16 sps:$4 sm:$0xff]  }
  0xbe   :  { %1830 = vmatpush1.bf16.msra.mxu0 %v4362_v50  ;;  %v4452_v50 = vld [vmem:[#allocation2 + $0x468] ss:$16 sps:$4 sm:$0xff]  }
  0xbf   :  { %1873 = vmatpush1.bf16.msra.mxu1 %v4365_v51  ;;  %1831 = vmatprep.subr.bf16.mxu0 %v4370_v52  ;;  %v4455_v51 = vld [vmem:[#allocation2 + $0x668] ss:$16 sps:$4 sm:$0xff]   ;;  %v4460_v52 = vld [vmem:[#allocation2 + $0x44c] ss:$16 sps:$4 sm:$0xff]  }
  0xc0   :  { %1874 = vmatprep.subr.bf16.mxu1 %v4373_v55  ;;  %v4461_v55 = vld [vmem:[#allocation2 + $0x648] ss:$16 sps:$4 sm:$0xff]  }
  0xc2   :  { %1832 = vmatpush1.bf16.msra.mxu0 %v4368_v56  ;;  %v4466_v56 = vld [vmem:[#allocation2 + $0x42c] ss:$16 sps:$4 sm:$0xff]  }
  0xc3   :  { %1875 = vmatpush1.bf16.msra.mxu1 %v4371_v57  ;;  %1833 = vmatprep.subr.bf16.mxu0 %v4376_v58  ;;  %v4469_v57 = vld [vmem:[#allocation2 + $0x62c] ss:$16 sps:$4 sm:$0xff]   ;;  %v4464_v58 = vld [vmem:[#allocation2 + $0x428] ss:$16 sps:$4 sm:$0xff]  }
  0xc4   :  { %1876 = vmatprep.subr.bf16.mxu1 %v4379_v59  ;;  %v4467_v59 = vld [vmem:[#allocation2 + $0x628] ss:$16 sps:$4 sm:$0xff]  }
  0xc6   :  { %1834 = vmatpush1.bf16.msra.mxu0 %v4374_v60  ;;  %v4472_v60 = vld [vmem:[#allocation2 + $0x40c] ss:$16 sps:$4 sm:$0xff]  }
  0xc7   :  { %1877 = vmatpush1.bf16.msra.mxu1 %v4377_v61  ;;  %1835 = vmatprep.subr.bf16.mxu0 %v4382_v62  ;;  %v4475_v61 = vld [vmem:[#allocation2 + $0x60c] ss:$16 sps:$4 sm:$0xff]   ;;  %v4470_v62 = vld [vmem:[#allocation2 + $0x408] ss:$16 sps:$4 sm:$0xff]  }
  0xc8   :  { %1878 = vmatprep.subr.bf16.mxu1 %v4385_v63  ;;  %v4473_v63 = vld [vmem:[#allocation2 + $0x608] ss:$16 sps:$4 sm:$0xff]  }
  0xca   :  { %1836 = vmatpush2.bf16.msra.mxu0 %v4380_v0  ;;  %v4478_v0 = vld [vmem:[#allocation2 + $0x5ec] ss:$16 sps:$4 sm:$0xff]  }
  0xcb   :  { %1879 = vmatpush2.bf16.msra.mxu1 %v4383_v1  ;;  %1837 = vmatprep.subr.bf16.mxu0 %v4388_v2  ;;  %v4481_v1 = vld [vmem:[#allocation2 + $0x7ec] ss:$16 sps:$4 sm:$0xff]   ;;  %v4476_v2 = vld [vmem:[#allocation2 + $0x5e8] ss:$16 sps:$4 sm:$0xff]  }
  0xcc   :  { %1880 = vmatprep.subr.bf16.mxu1 %v4391_v3  ;;  %v4479_v3 = vld [vmem:[#allocation2 + $0x7e8] ss:$16 sps:$4 sm:$0xff]  }
  0xce   :  { %1838 = vmatpush2.bf16.msra.mxu0 %v4386_v4  ;;  %v4484_v4 = vld [vmem:[#allocation2 + $0x5cc] ss:$16 sps:$4 sm:$0xff]  }
  0xcf   :  { %1881 = vmatpush2.bf16.msra.mxu1 %v4389_v5  ;;  %1839 = vmatprep.subr.bf16.mxu0 %v4394_v6  ;;  %v4487_v5 = vld [vmem:[#allocation2 + $0x7cc] ss:$16 sps:$4 sm:$0xff]   ;;  %v4482_v6 = vld [vmem:[#allocation2 + $0x5c8] ss:$16 sps:$4 sm:$0xff]  }
  0xd0   :  { %1882 = vmatprep.subr.bf16.mxu1 %v4397_v7  ;;  %v4485_v7 = vld [vmem:[#allocation2 + $0x7c8] ss:$16 sps:$4 sm:$0xff]  }
  0xd2   :  { %1840 = vmatpush2.bf16.msra.mxu0 %v4392_v8  ;;  %v4490_v8 = vld [vmem:[#allocation2 + $0x5ac] ss:$16 sps:$4 sm:$0xff]  }
  0xd3   :  { %1883 = vmatpush2.bf16.msra.mxu1 %v4395_v9  ;;  %1841 = vmatprep.subr.bf16.mxu0 %v4400_v10  ;;  %v4493_v9 = vld [vmem:[#allocation2 + $0x7ac] ss:$16 sps:$4 sm:$0xff]   ;;  %v4488_v10 = vld [vmem:[#allocation2 + $0x5a8] ss:$16 sps:$4 sm:$0xff]  }
  0xd4   :  { %1884 = vmatprep.subr.bf16.mxu1 %v4403_v11  ;;  %v4491_v11 = vld [vmem:[#allocation2 + $0x7a8] ss:$16 sps:$4 sm:$0xff]  }
  0xd6   :  { %1842 = vmatpush2.bf16.msra.mxu0 %v4398_v14  ;;  %v4496_v14 = vld [vmem:[#allocation2 + $0x58c] ss:$16 sps:$4 sm:$0xff]  }
  0xd7   :  { %1885 = vmatpush2.bf16.msra.mxu1 %v4401_v15  ;;  %1843 = vmatprep.subr.bf16.mxu0 %v4406_v16  ;;  %v4499_v15 = vld [vmem:[#allocation2 + $0x78c] ss:$16 sps:$4 sm:$0xff]   ;;  %v4494_v16 = vld [vmem:[#allocation2 + $0x588] ss:$16 sps:$4 sm:$0xff]  }
  0xd8   :  { %1886 = vmatprep.subr.bf16.mxu1 %v4409_v17  ;;  %v4497_v17 = vld [vmem:[#allocation2 + $0x788] ss:$16 sps:$4 sm:$0xff]  }
  0xda   :  { %1844 = vmatpush2.bf16.msra.mxu0 %v4404_v18  ;;  %v4502_v18 = vld [vmem:[#allocation2 + $0x56c] ss:$16 sps:$4 sm:$0xff]  }
  0xdb   :  { %1887 = vmatpush2.bf16.msra.mxu1 %v4407_v19  ;;  %1845 = vmatprep.subr.bf16.mxu0 %v4412_v20  ;;  %v4505_v19 = vld [vmem:[#allocation2 + $0x76c] ss:$16 sps:$4 sm:$0xff]   ;;  %v4500_v20 = vld [vmem:[#allocation2 + $0x568] ss:$16 sps:$4 sm:$0xff]  }
  0xdc   :  { %1888 = vmatprep.subr.bf16.mxu1 %v4415_v21  ;;  %v4503_v21 = vld [vmem:[#allocation2 + $0x768] ss:$16 sps:$4 sm:$0xff]  }
  0xde   :  { %1846 = vmatpush2.bf16.msra.mxu0 %v4410_v22  ;;  %v4508_v22 = vld [vmem:[#allocation2 + $0x54c] ss:$16 sps:$4 sm:$0xff]  }
  0xdf   :  { %1889 = vmatpush2.bf16.msra.mxu1 %v4413_v23  ;;  %1847 = vmatprep.subr.bf16.mxu0 %v4418_v24  ;;  %v4511_v23 = vld [vmem:[#allocation2 + $0x74c] ss:$16 sps:$4 sm:$0xff]   ;;  %v4506_v24 = vld [vmem:[#allocation2 + $0x548] ss:$16 sps:$4 sm:$0xff]  }
  0xe0   :  { %1890 = vmatprep.subr.bf16.mxu1 %v4421_v25  ;;  %v4509_v25 = vld [vmem:[#allocation2 + $0x748] ss:$16 sps:$4 sm:$0xff]  }
  0xe2   :  { %1848 = vmatpush2.bf16.msra.mxu0 %v4416_v26  ;;  %v4514_v26 = vld [vmem:[#allocation2 + $0x52c] ss:$16 sps:$4 sm:$0xff]  }
  0xe3   :  { %1891 = vmatpush2.bf16.msra.mxu1 %v4419_v27  ;;  %1849 = vmatprep.subr.bf16.mxu0 %v4424_v30  ;;  %v4517_v27 = vld [vmem:[#allocation2 + $0x72c] ss:$16 sps:$4 sm:$0xff]   ;;  %v4512_v30 = vld [vmem:[#allocation2 + $0x528] ss:$16 sps:$4 sm:$0xff]  }
  0xe4   :  { %1892 = vmatprep.subr.bf16.mxu1 %v4427_v31  ;;  %v4515_v31 = vld [vmem:[#allocation2 + $0x728] ss:$16 sps:$4 sm:$0xff]  }
  0xe6   :  { %1850 = vmatpush2.bf16.msra.mxu0 %v4422_v32  ;;  %v4520_v32 = vld [vmem:[#allocation2 + $0x50c] ss:$16 sps:$4 sm:$0xff]  }
  0xe7   :  { %1893 = vmatpush2.bf16.msra.mxu1 %v4425_v33  ;;  %1905 = vmatprep.subr.bf16.mxu0 %v4430_v34  ;;  %v4523_v33 = vld [vmem:[#allocation2 + $0x70c] ss:$16 sps:$4 sm:$0xff]   ;;  %v4518_v34 = vld [vmem:[#allocation2 + $0x508] ss:$16 sps:$4 sm:$0xff]  }
  0xe8   :  { %1948 = vmatprep.subr.bf16.mxu1 %v4433_v35  ;;  %v4521_v35 = vld [vmem:[#allocation2 + $0x708] ss:$16 sps:$4 sm:$0xff]  }
  0xe9   :  { %1852 = vmatmul.mubr.bf16.vlgmr.msra.gmra.mxu0 %v4913_v12  ;;  %v4451_v12 = vld [vmem:[#allocation2 + $0x68c] ss:$16 sps:$4 sm:$0xff]  }
  0xea   :  { %1895 = vmatmul.mubr.bf16.vlgmr.msra.gmra.mxu1 %v4915_v13  ;;  %1906 = vmatpush1.bf16.msra.mxu0 %v4428_v36  ;;  %v4449_v13 = vld [vmem:[#allocation2 + $0x688] ss:$16 sps:$4 sm:$0xff]   ;;  %v4526_v36 = vld [vmem:[#allocation4 + $0x74] ss:$8 sps:$4 sm:$0xff]  }
  0xeb   :  { %1949 = vmatpush1.bf16.msra.mxu1 %v4431_v37  ;;  %1907 = vmatprep.subr.bf16.mxu0 %v4436_v38  ;;  %v4524_v37 = vld [vmem:[#allocation4 + $0x70] ss:$8 sps:$4 sm:$0xff]   ;;  %v4529_v38 = vld [vmem:[#allocation4 + $0x64] ss:$8 sps:$4 sm:$0xff]  }
  0xec   :  { %1950 = vmatprep.subr.bf16.mxu1 %v4439_v39  ;;  %1937 = vmatprep.mubr.bf16.mxu0 %v4928_v45  ;;  %v4463_v45 = vld [vmem:[#allocation2 + $0x64c] ss:$16 sps:$4 sm:$0xff]   ;;  %v4527_v39 = vld [vmem:[#allocation4 + $0x60] ss:$8 sps:$4 sm:$0xff]  }
  0xed   :  { %1980 = vmatprep.mubr.bf16.mxu1 %v4933_v47  ;;  %v4458_v47 = vld [vmem:[#allocation2 + $0x448] ss:$16 sps:$4 sm:$0xff]  }
  0xee   :  { %1908 = vmatpush1.bf16.msra.mxu0 %v4434_v40  ;;  %v4532_v40 = vld [vmem:[#allocation4 + $0x54] ss:$8 sps:$4 sm:$0xff]  }
  0xef   :  { %1951 = vmatpush1.bf16.msra.mxu1 %v4437_v41  ;;  %1909 = vmatprep.subr.bf16.mxu0 %v4442_v42  ;;  %v4530_v41 = vld [vmem:[#allocation4 + $0x50] ss:$8 sps:$4 sm:$0xff]   ;;  %v4535_v42 = vld [vmem:[#allocation4 + $0x44] ss:$8 sps:$4 sm:$0xff]  }
  0xf0   :  { %1952 = vmatprep.subr.bf16.mxu1 %v4445_v43  ;;  %v4533_v43 = vld [vmem:[#allocation4 + $0x40] ss:$8 sps:$4 sm:$0xff]  }
  0xf2   :  { %1910 = vmatpush1.bf16.msra.mxu0 %v4440_v44  ;;  %v4572_v44 = vld [vmem:[#allocation4 + $0x170] ss:$8 sps:$4 sm:$0xff]  }
  0xf3   :  { %1953 = vmatpush1.bf16.msra.mxu1 %v4443_v46  ;;  %1911 = vmatprep.subr.bf16.mxu0 %v4448_v48  ;;  %v4574_v46 = vld [vmem:[#allocation4 + $0x174] ss:$8 sps:$4 sm:$0xff]  }
  0xf4   :  { %1954 = vmatprep.subr.bf16.mxu1 %v4451_v12  ;;  %v4538_v48 = vld [vmem:[#allocation4 + $0x34] ss:$8 sps:$4 sm:$0xff]   ;;  %v4577_v12 = vld [vmem:[#allocation4 + $0x164] ss:$8 sps:$4 sm:$0xff]  }
  0xf6   :  { %1912 = vmatpush1.bf16.msra.mxu0 %v4446_v53  ;;  %v4580_v53 = vld [vmem:[#allocation4 + $0x154] ss:$8 sps:$4 sm:$0xff]  }
  0xf7   :  { %1955 = vmatpush1.bf16.msra.mxu1 %v4449_v13  ;;  %1913 = vmatprep.subr.bf16.mxu0 %v4454_v54  ;;  %v4541_v13 = vld [vmem:[#allocation4 + $0x24] ss:$8 sps:$4 sm:$0xff]   ;;  %v4578_v54 = vld [vmem:[#allocation4 + $0x150] ss:$8 sps:$4 sm:$0xff]  }
  0xf8   :  { %1956 = vmatprep.subr.bf16.mxu1 %v4457_v49  ;;  %v4539_v49 = vld [vmem:[#allocation4 + $0x20] ss:$8 sps:$4 sm:$0xff]  }
  0xfa   :  { %1914 = vmatpush1.bf16.msra.mxu0 %v4452_v50  ;;  %v4583_v50 = vld [vmem:[#allocation4 + $0x144] ss:$8 sps:$4 sm:$0xff]  }
  0xfb   :  { %1957 = vmatpush1.bf16.msra.mxu1 %v4455_v51  ;;  %1915 = vmatprep.subr.bf16.mxu0 %v4460_v52  ;;  %v4544_v51 = vld [vmem:[#allocation4 + $0x14] ss:$8 sps:$4 sm:$0xff]   ;;  %v4581_v52 = vld [vmem:[#allocation4 + $0x140] ss:$8 sps:$4 sm:$0xff]  }
  0xfc   :  { %1958 = vmatprep.subr.bf16.mxu1 %v4463_v45  ;;  %v4542_v45 = vld [vmem:[#allocation4 + $0x10] ss:$8 sps:$4 sm:$0xff]  }
  0xfe   :  { %1916 = vmatpush1.bf16.msra.mxu0 %v4458_v47  ;;  %v4586_v47 = vld [vmem:[#allocation4 + $0x134] ss:$8 sps:$4 sm:$0xff]  }
  0xff   :  { %1959 = vmatpush1.bf16.msra.mxu1 %v4461_v55  ;;  %1917 = vmatprep.subr.bf16.mxu0 %v4466_v56  ;;  %v4547_v55 = vld [vmem:[#allocation4 + $0x4] ss:$8 sps:$4 sm:$0xff]   ;;  %v4584_v56 = vld [vmem:[#allocation4 + $0x130] ss:$8 sps:$4 sm:$0xff]  }
 0x100   :  { %1960 = vmatprep.subr.bf16.mxu1 %v4469_v57  ;;  %v4545_v57 = vld [vmem:[#allocation4] ss:$8 sps:$4 sm:$0xff]  }
 0x102   :  { %1918 = vmatpush1.bf16.msra.mxu0 %v4464_v58  ;;  %v4589_v58 = vld [vmem:[#allocation4 + $0x124] ss:$8 sps:$4 sm:$0xff]  }
 0x103   :  { %1961 = vmatpush1.bf16.msra.mxu1 %v4467_v59  ;;  %1919 = vmatprep.subr.bf16.mxu0 %v4472_v60  ;;  %v4550_v59 = vld [vmem:[#allocation4 + $0xf4] ss:$8 sps:$4 sm:$0xff]   ;;  %v4587_v60 = vld [vmem:[#allocation4 + $0x120] ss:$8 sps:$4 sm:$0xff]  }
 0x104   :  { %1962 = vmatprep.subr.bf16.mxu1 %v4475_v61  ;;  %v4548_v61 = vld [vmem:[#allocation4 + $0xf0] ss:$8 sps:$4 sm:$0xff]  }
 0x106   :  { %1920 = vmatpush1.bf16.msra.mxu0 %v4470_v62  ;;  %v4592_v62 = vld [vmem:[#allocation4 + $0x114] ss:$8 sps:$4 sm:$0xff]  }
 0x107   :  { %1963 = vmatpush1.bf16.msra.mxu1 %v4473_v63  ;;  %1921 = vmatprep.subr.bf16.mxu0 %v4478_v0  ;;  %v4553_v63 = vld [vmem:[#allocation4 + $0xe4] ss:$8 sps:$4 sm:$0xff]   ;;  %v4590_v0 = vld [vmem:[#allocation4 + $0x110] ss:$8 sps:$4 sm:$0xff]  }
 0x108   :  { %1964 = vmatprep.subr.bf16.mxu1 %v4481_v1  ;;  %v4551_v1 = vld [vmem:[#allocation4 + $0xe0] ss:$8 sps:$4 sm:$0xff]  }
 0x10a   :  { %1922 = vmatpush2.bf16.msra.mxu0 %v4476_v2  ;;  %v4595_v2 = vld [vmem:[#allocation4 + $0x104] ss:$8 sps:$4 sm:$0xff]  }
 0x10b   :  { %1965 = vmatpush2.bf16.msra.mxu1 %v4479_v3  ;;  %1923 = vmatprep.subr.bf16.mxu0 %v4484_v4  ;;  %v4556_v3 = vld [vmem:[#allocation4 + $0xd4] ss:$8 sps:$4 sm:$0xff]   ;;  %v4593_v4 = vld [vmem:[#allocation4 + $0x100] ss:$8 sps:$4 sm:$0xff]  }
 0x10c   :  { %1966 = vmatprep.subr.bf16.mxu1 %v4487_v5  ;;  %v4554_v5 = vld [vmem:[#allocation4 + $0xd0] ss:$8 sps:$4 sm:$0xff]  }
 0x10e   :  { %1924 = vmatpush2.bf16.msra.mxu0 %v4482_v6  ;;  %v4598_v6 = vld [vmem:[#allocation4 + $0x1f4] ss:$8 sps:$4 sm:$0xff]  }
 0x10f   :  { %1967 = vmatpush2.bf16.msra.mxu1 %v4485_v7  ;;  %1925 = vmatprep.subr.bf16.mxu0 %v4490_v8  ;;  %v4559_v7 = vld [vmem:[#allocation4 + $0xc4] ss:$8 sps:$4 sm:$0xff]   ;;  %v4596_v8 = vld [vmem:[#allocation4 + $0x1f0] ss:$8 sps:$4 sm:$0xff]  }
 0x110   :  { %1968 = vmatprep.subr.bf16.mxu1 %v4493_v9  ;;  %v4557_v9 = vld [vmem:[#allocation4 + $0xc0] ss:$8 sps:$4 sm:$0xff]  }
 0x112   :  { %1926 = vmatpush2.bf16.msra.mxu0 %v4488_v10  ;;  %v4601_v10 = vld [vmem:[#allocation4 + $0x1e4] ss:$8 sps:$4 sm:$0xff]  }
 0x113   :  { %1969 = vmatpush2.bf16.msra.mxu1 %v4491_v11  ;;  %1927 = vmatprep.subr.bf16.mxu0 %v4496_v14  ;;  %v4562_v11 = vld [vmem:[#allocation4 + $0xb4] ss:$8 sps:$4 sm:$0xff]   ;;  %v4599_v14 = vld [vmem:[#allocation4 + $0x1e0] ss:$8 sps:$4 sm:$0xff]  }
 0x114   :  { %1970 = vmatprep.subr.bf16.mxu1 %v4499_v15  ;;  %v347_v15 = vlaneseq }
 0x116   :  { %1928 = vmatpush2.bf16.msra.mxu0 %v4494_v16  ;;  %v4560_v16 = vld [vmem:[#allocation4 + $0xb0] ss:$8 sps:$4 sm:$0xff]  }
 0x117   :  { %1971 = vmatpush2.bf16.msra.mxu1 %v4497_v17  ;;  %1929 = vmatprep.subr.bf16.mxu0 %v4502_v18  ;;  %v4604_v17 = vld [vmem:[#allocation4 + $0x1d4] ss:$8 sps:$4 sm:$0xff]   ;;  %v4565_v18 = vld [vmem:[#allocation4 + $0xa4] ss:$8 sps:$4 sm:$0xff]  }
 0x118   :  { %1972 = vmatprep.subr.bf16.mxu1 %v4505_v19  ;;  %v4602_v19 = vld [vmem:[#allocation4 + $0x1d0] ss:$8 sps:$4 sm:$0xff]  }
 0x11a   :  { %1930 = vmatpush2.bf16.msra.mxu0 %v4500_v20  ;;  %v4964_v20 = vshrl.u32 %v347_v15, 7 }
 0x11b   :  { %1973 = vmatpush2.bf16.msra.mxu1 %v4503_v21  ;;  %1931 = vmatprep.subr.bf16.mxu0 %v4508_v22  ;;  %v4563_v21 = vld [vmem:[#allocation4 + $0xa0] ss:$8 sps:$4 sm:$0xff]   ;;  %v4607_v22 = vld [vmem:[#allocation4 + $0x1c4] ss:$8 sps:$4 sm:$0xff]  }
 0x11c   :  { %1974 = vmatprep.subr.bf16.mxu1 %v4511_v23 }
 0x11e   :  { %1932 = vmatpush2.bf16.msra.mxu0 %v4506_v24 }
 0x11f   :  { %1975 = vmatpush2.bf16.msra.mxu1 %v4509_v25  ;;  %1933 = vmatprep.subr.bf16.mxu0 %v4514_v26  ;;  %v4568_v25 = vld [vmem:[#allocation4 + $0x94] ss:$8 sps:$4 sm:$0xff]   ;;  %v4605_v26 = vld [vmem:[#allocation4 + $0x1c0] ss:$8 sps:$4 sm:$0xff]  }
 0x120   :  { %1976 = vmatprep.subr.bf16.mxu1 %v4517_v27  ;;  %v4967_v27 = vsub.s32 1, %v4964_v20 }
 0x122   :  { %1934 = vmatpush2.bf16.msra.mxu0 %v4512_v30  ;;  %v4566_v30 = vld [vmem:[#allocation4 + $0x90] ss:$8 sps:$4 sm:$0xff]  }
 0x123   :  { %1977 = vmatpush2.bf16.msra.mxu1 %v4515_v31  ;;  %1935 = vmatprep.subr.bf16.mxu0 %v4520_v32  ;;  %v4972_v31 = vld [vmem:[%s5130_s1] sm:$0xf]  ;;  %v4975_v32 = vsub.s32 0, %v4964_v20 }
 0x124   :  { %1978 = vmatprep.subr.bf16.mxu1 %v4523_v33 }
 0x126   :  { %1936 = vmatpush2.bf16.msra.mxu0 %v4518_v34 }
 0x127   :  { %1979 = vmatpush2.bf16.msra.mxu1 %v4521_v35  ;;  %2399 = vmatprep.subr.bf16.mxu0 %v4526_v36  ;;  %v4571_v35 = vld [vmem:[#allocation4 + $0x84] ss:$8 sps:$4 sm:$0xff]   ;;  %v354_v36 = vrot.slane %v4972_v31, %v4967_v27 }
 0x128   :  { %2442 = vmatprep.subr.bf16.mxu1 %v4574_v46  ;;  %v4610_v46 = vld [vmem:[#allocation4 + $0x1b4] ss:$8 sps:$4 sm:$0xff]  }
 0x129   :  { %1938 = vmatmul.mubr.bf16.vlgmr.msra.gmra.mxu0 %v4949_v28  ;;  %v4575_v28 = vld [vmem:[#allocation4 + $0x160] ss:$8 sps:$4 sm:$0xff]   ;;  %v1681_v23 = vpop.f32.mrf.mxu0 }
 0x12a   :  { %1981 = vmatmul.mubr.bf16.vlgmr.msra.gmra.mxu1 %v4951_v29  ;;  %2400 = vmatpush1.bf16.msra.mxu0 %v4524_v37  ;;  %v4536_v29 = vld [vmem:[#allocation4 + $0x30] ss:$8 sps:$4 sm:$0xff]   ;;  %v1724_v24 = vpop.f32.mrf.mxu1  ;;  %v4569_v37 = vld [vmem:[#allocation4 + $0x80] ss:$8 sps:$4 sm:$0xff]  }
 0x12b   :  { %2401 = vmatprep.subr.bf16.mxu0 %v4529_v38  ;;  %2443 = vmatpush1.bf16.msra.mxu1 %v4572_v44  ;;  %v1683_v33 = vpop.f32.mrf.mxu0  ;;  %v350_v38 = vrot.slane %v4972_v31, %v4975_v32 }
 0x12c   :  { %2444 = vmatprep.subr.bf16.mxu1 %v4577_v12  ;;  %v1726_v34 = vpop.f32.mrf.mxu1  ;;  %v4608_v12 = vld [vmem:[#allocation4 + $0x1b0] ss:$8 sps:$4 sm:$0xff]  }
 0x12e   :  { %2402 = vmatpush1.bf16.msra.mxu0 %v4527_v39  ;;  %v1685_v39 = vpop.f32.mrf.mxu0 }
 0x12f   :  { %2403 = vmatprep.subr.bf16.mxu0 %v4532_v40  ;;  %2445 = vmatpush1.bf16.msra.mxu1 %v4575_v28  ;;  %v1728_v40 = vpop.f32.mrf.mxu1 }
 0x130   :  { %2446 = vmatprep.subr.bf16.mxu1 %v4580_v53 }
 0x131   :  { %v1730_v44 = vpop.f32.mrf.mxu1 }
 0x132   :  { %2404 = vmatpush1.bf16.msra.mxu0 %v4530_v41  ;;  %v1684_v41 = vadd.f32 %v1683_v33, %v354_v36  ;;  %v4635_v33 = vld [vmem:[#allocation6 + $0x50] ss:$20 sps:$4 sm:$0xff]  }
 0x133   :  { %2405 = vmatprep.subr.bf16.mxu0 %v4535_v42  ;;  %2447 = vmatpush1.bf16.msra.mxu1 %v4578_v54  ;;  %v1682_v42 = vadd.f32 %v1681_v23, %v350_v38  ;;  %v4631_v23 = vld [vmem:[#allocation6 + $0xa4] ss:$20 sps:$4 sm:$0xff]  }
 0x134   :  { %2448 = vmatprep.subr.bf16.mxu1 %v4583_v50  ;;  %v1727_v53 = vadd.f32 %v1726_v34, %v1684_v41  ;;  %v4640_v34 = vld [vmem:[#allocation6 + $0x2c] ss:$20 sps:$4 sm:$0xff]   ;;  %v361_v41 = vsub.s32 3, %v4964_v20 }
 0x135   :  { %v1725_v54 = vadd.f32 %v1724_v24, %v1682_v42  ;;  %v4629_v24 = vld [vmem:[#allocation6 + $0xa0] ss:$20 sps:$4 sm:$0xff]   ;;  %v357_v42 = vsub.s32 2, %v4964_v20 }
 0x136   :  { %2406 = vmatpush1.bf16.msra.mxu0 %v4533_v43  ;;  %v1687_v43 = vpop.f32.mrf.mxu0 }
 0x137   :  { %2407 = vmatprep.subr.bf16.mxu0 %v4538_v48  ;;  %2449 = vmatpush1.bf16.msra.mxu1 %v4581_v52  ;;  %v1686_v48 = vadd.f32 %v1685_v39, %v350_v38  ;;  %v4641_v39 = vld [vmem:[#allocation6] ss:$20 sps:$4 sm:$0xff]  }
 0x138   :  { %2450 = vmatprep.subr.bf16.mxu1 %v4586_v47  ;;  %v4611_v47 = vld [vmem:[#allocation4 + $0x1a0] ss:$8 sps:$4 sm:$0xff]  }
 0x139   :  { %v1729_v52 = vadd.f32 %v1728_v40, %v1686_v48  ;;  %v4646_v40 = vld [vmem:[#allocation6 + $0x25c] ss:$20 sps:$4 sm:$0xff]   ;;  %v4649_v48 = vld [vmem:[#allocation6 + $0x234] ss:$20 sps:$4 sm:$0xff]  }
 0x13a   :  { %2408 = vmatpush1.bf16.msra.mxu0 %v4536_v29 }
 0x13b   :  { %2409 = vmatprep.subr.bf16.mxu0 %v4541_v13  ;;  %2451 = vmatpush1.bf16.msra.mxu1 %v4584_v56  ;;  %v1688_v13 = vadd.f32 %v1687_v43, %v354_v36  ;;  %v4643_v36 = vld [vmem:[#allocation6 + $0x4] ss:$20 sps:$4 sm:$0xff]  }
 0x13c   :  { %2452 = vmatprep.subr.bf16.mxu1 %v4589_v58 }
 0x13d   :  { %v1731_v58 = vadd.f32 %v1730_v44, %v1688_v13  ;;  %v4647_v13 = vld [vmem:[#allocation6 + $0x230] ss:$20 sps:$4 sm:$0xff]  }
 0x13e   :  { %2410 = vmatpush1.bf16.msra.mxu0 %v4539_v49 }
 0x13f   :  { %2411 = vmatprep.subr.bf16.mxu0 %v4544_v51  ;;  %2453 = vmatpush1.bf16.msra.mxu1 %v4587_v60  ;;  %v4613_v51 = vld [vmem:[#allocation4 + $0x1a4] ss:$8 sps:$4 sm:$0xff]  }
 0x140   :  { %2454 = vmatprep.subr.bf16.mxu1 %v4592_v62 }
 0x142   :  { %2412 = vmatpush1.bf16.msra.mxu0 %v4542_v45 }
 0x143   :  { %2413 = vmatprep.subr.bf16.mxu0 %v4547_v55  ;;  %2455 = vmatpush1.bf16.msra.mxu1 %v4590_v0 }
 0x144   :  { %2456 = vmatprep.subr.bf16.mxu1 %v4595_v2 }
 0x146   :  { %2414 = vmatpush1.bf16.msra.mxu0 %v4545_v57 }
 0x147   :  { %2415 = vmatprep.subr.bf16.mxu0 %v4550_v59  ;;  %2457 = vmatpush1.bf16.msra.mxu1 %v4593_v4 }
 0x148   :  { %2458 = vmatprep.subr.bf16.mxu1 %v4598_v6  ;;  %v4619_v6 = vld [vmem:[#allocation4 + $0x184] ss:$8 sps:$4 sm:$0xff]  }
 0x14a   :  { %2416 = vmatpush2.bf16.msra.mxu0 %v4548_v61  ;;  %v4616_v61 = vld [vmem:[#allocation4 + $0x194] ss:$8 sps:$4 sm:$0xff]  }
 0x14b   :  { %2417 = vmatprep.subr.bf16.mxu0 %v4553_v63  ;;  %2459 = vmatpush2.bf16.msra.mxu1 %v4596_v8 }
 0x14c   :  { %2460 = vmatprep.subr.bf16.mxu1 %v4601_v10 }
 0x14e   :  { %2418 = vmatpush2.bf16.msra.mxu0 %v4551_v1  ;;  %v4614_v1 = vld [vmem:[#allocation4 + $0x190] ss:$8 sps:$4 sm:$0xff]  }
 0x14f   :  { %2419 = vmatprep.subr.bf16.mxu0 %v4556_v3  ;;  %2461 = vmatpush2.bf16.msra.mxu1 %v4599_v14 }
 0x150   :  { %2462 = vmatprep.subr.bf16.mxu1 %v4604_v17  ;;  %v4622_v17 = vld [vmem:[#allocation6 + $0x11c] ss:$20 sps:$4 sm:$0xff]  }
 0x152   :  { %2420 = vmatpush2.bf16.msra.mxu0 %v4554_v5 }
 0x153   :  { %2421 = vmatprep.subr.bf16.mxu0 %v4559_v7  ;;  %2463 = vmatpush2.bf16.msra.mxu1 %v4602_v19  ;;  %v4623_v19 = vld [vmem:[#allocation6 + $0xf0] ss:$20 sps:$4 sm:$0xff]  }
 0x154   :  { %2464 = vmatprep.subr.bf16.mxu1 %v4607_v22  ;;  %v4626_v22 = vld [vmem:[#allocation6 + $0xc8] ss:$20 sps:$4 sm:$0xff]  }
 0x156   :  { %2422 = vmatpush2.bf16.msra.mxu0 %v4557_v9  ;;  %v4617_v9 = vld [vmem:[#allocation4 + $0x180] ss:$8 sps:$4 sm:$0xff]  }
 0x157   :  { %2423 = vmatprep.subr.bf16.mxu0 %v4562_v11  ;;  %2465 = vmatpush2.bf16.msra.mxu1 %v4605_v26  ;;  %v4632_v26 = vld [vmem:[#allocation6 + $0x78] ss:$20 sps:$4 sm:$0xff]  }
 0x158   :  { %2466 = vmatprep.subr.bf16.mxu1 %v4610_v46  ;;  %v4644_v46 = vld [vmem:[#allocation6 + $0x258] ss:$20 sps:$4 sm:$0xff]  }
 0x15a   :  { %2424 = vmatpush2.bf16.msra.mxu0 %v4560_v16  ;;  %v4620_v16 = vld [vmem:[#allocation6 + $0x118] ss:$20 sps:$4 sm:$0xff]  }
 0x15b   :  { %2425 = vmatprep.subr.bf16.mxu0 %v4565_v18  ;;  %2467 = vmatpush2.bf16.msra.mxu1 %v4608_v12  ;;  %v4625_v18 = vld [vmem:[#allocation6 + $0xf4] ss:$20 sps:$4 sm:$0xff]   ;;  %v362_v12 = vrot.slane %v4972_v31, %v361_v41 }
 0x15c   :  { %2468 = vmatprep.subr.bf16.mxu1 %v4613_v51  ;;  %v4676_v41 = vld [vmem:[#allocation6 + $0xd4] ss:$20 sps:$4 sm:$0xff]  }
 0x15e   :  { %2426 = vmatpush2.bf16.msra.mxu0 %v4563_v21  ;;  %v4628_v21 = vld [vmem:[#allocation6 + $0xcc] ss:$20 sps:$4 sm:$0xff]  }
 0x15f   :  { %2427 = vmatprep.subr.bf16.mxu0 %v4568_v25  ;;  %2469 = vmatpush2.bf16.msra.mxu1 %v4611_v47  ;;  %v4634_v25 = vld [vmem:[#allocation6 + $0x7c] ss:$20 sps:$4 sm:$0xff]  }
 0x160   :  { %2470 = vmatprep.subr.bf16.mxu1 %v4616_v61 }
 0x162   :  { %2428 = vmatpush2.bf16.msra.mxu0 %v4566_v30  ;;  %v4637_v30 = vld [vmem:[#allocation6 + $0x54] ss:$20 sps:$4 sm:$0xff]  }
 0x163   :  { %2429 = vmatprep.subr.bf16.mxu0 %v4571_v35  ;;  %2471 = vmatpush2.bf16.msra.mxu1 %v4614_v1  ;;  %v4638_v35 = vld [vmem:[#allocation6 + $0x28] ss:$20 sps:$4 sm:$0xff]  }
 0x164   :  { %2472 = vmatprep.subr.bf16.mxu1 %v4619_v6  ;;  %v4658_v1 = vld [vmem:[#allocation6 + $0x1bc] ss:$20 sps:$4 sm:$0xff]  }
 0x166   :  { %2430 = vmatpush2.bf16.msra.mxu0 %v4569_v37 }
 0x167   :  { %2473 = vmatpush2.bf16.msra.mxu1 %v4617_v9  ;;  %2695 = vmatprep.subr.bf16.mxu0 %v4622_v17 }
 0x169   :  { %v1767_v28 = vpop.f32.mrf.mxu0 }
 0x16a   :  { %v1810_v29 = vpop.f32.mrf.mxu1  ;;  %v1768_v55 = vadd.f32 %v1767_v28, %v1725_v54  ;;  %v358_v28 = vrot.slane %v4972_v31, %v357_v42  ;;  %v4652_v54 = vld [vmem:[#allocation6 + $0x20c] ss:$20 sps:$4 sm:$0xff]   ;;  %v4674_v42 = vld [vmem:[#allocation6 + $0xd0] ss:$20 sps:$4 sm:$0xff]  }
 0x16b   :  { %v1769_v49 = vpop.f32.mrf.mxu0 }
 0x16c   :  { %v1812_v50 = vpop.f32.mrf.mxu1  ;;  %v1770_v45 = vadd.f32 %v1769_v49, %v1727_v53  ;;  %v1811_v2 = vadd.f32 %v1810_v29, %v1768_v55  ;;  %v4655_v55 = vld [vmem:[#allocation6 + $0x1e4] ss:$20 sps:$4 sm:$0xff]  }
 0x16d   :  { %v1771_v56 = vpop.f32.mrf.mxu0 }
 0x16e   :  { %v1814_v57 = vpop.f32.mrf.mxu1  ;;  %v1772_v59 = vadd.f32 %v1771_v56, %v1729_v52  ;;  %v1813_v62 = vadd.f32 %v1812_v50, %v1770_v45  ;;  %v1991_v10 = vmax.f32 %v1811_v2, 0.0  ;;  %v4650_v45 = vld [vmem:[#allocation6 + $0x208] ss:$20 sps:$4 sm:$0xff]  }
 0x16f   :  { %v1773_v60 = vpop.f32.mrf.mxu0 }
 0x170   :  { %v1815_v63 = vadd.f32 %v1814_v57, %v1772_v59  ;;  %v1774_v0 = vadd.f32 %v1773_v60, %v1731_v58  ;;  %v1816_v3 = vpop.f32.mrf.mxu1  ;;  %v1992_v7 = vmax.f32 %v1813_v62, 0.0  ;;  %v4653_v62 = vld [vmem:[#allocation6 + $0x1e0] ss:$20 sps:$4 sm:$0xff]  }
 0x172   :  { %v1817_v4 = vadd.f32 %v1816_v3, %v1774_v0  ;;  %v1995_v5 = vmax.f32 %v1815_v63, 0.0 }
 0x174   :  { %v1996_v8 = vmax.f32 %v1817_v4, 0.0  ;;  %v2064_v14 = vpack.c.bf16 %v1995_v5, %v1991_v10 }
 0x176   :  { %v2065_v11 = vpack.c.bf16 %v1996_v8, %v1992_v7  ;;  %v4656_v8 = vld [vmem:[#allocation6 + $0x1b8] ss:$20 sps:$4 sm:$0xff]  }
 0x178   :  { %2431 = vmatprep.mubr.bf16.mxu0 %v2065_v11 }
 0x179   :  { %2432 = vmatmul.mubr.bf16.vlgmr.msra.gmra.mxu0 %v2064_v14 }
 0x17a   :  { %2696 = vmatpush1.bf16.msra.mxu0 %v4620_v16 }
 0x17b   :  { %2697 = vmatprep.subr.bf16.mxu0 %v4625_v18 }
 0x17e   :  { %2698 = vmatpush1.bf16.msra.mxu0 %v4623_v19 }
 0x17f   :  { %2699 = vmatprep.subr.bf16.mxu0 %v4628_v21 }
 0x182   :  { %2700 = vmatpush1.bf16.msra.mxu0 %v4626_v22 }
 0x183   :  { %2701 = vmatprep.subr.bf16.mxu0 %v4631_v23 }
 0x186   :  { %2702 = vmatpush1.bf16.msra.mxu0 %v4629_v24 }
 0x187   :  { %2703 = vmatprep.subr.bf16.mxu0 %v4634_v25  ;;  %v4661_v25 = vld [vmem:[#allocation6 + $0x194] ss:$20 sps:$4 sm:$0xff]  }
 0x18a   :  { %2704 = vmatpush1.bf16.msra.mxu0 %v4632_v26  ;;  %v4659_v26 = vld [vmem:[#allocation6 + $0x190] ss:$20 sps:$4 sm:$0xff]  }
 0x18b   :  { %2705 = vmatprep.subr.bf16.mxu0 %v4637_v30  ;;  %v4664_v30 = vld [vmem:[#allocation6 + $0x16c] ss:$20 sps:$4 sm:$0xff]  }
 0x18e   :  { %2706 = vmatpush1.bf16.msra.mxu0 %v4635_v33  ;;  %v4662_v33 = vld [vmem:[#allocation6 + $0x168] ss:$20 sps:$4 sm:$0xff]  }
 0x18f   :  { %2707 = vmatprep.subr.bf16.mxu0 %v4640_v34  ;;  %v4667_v34 = vld [vmem:[#allocation6 + $0x144] ss:$20 sps:$4 sm:$0xff]  }
 0x192   :  { %2708 = vmatpush1.bf16.msra.mxu0 %v4638_v35  ;;  %v4665_v35 = vld [vmem:[#allocation6 + $0x140] ss:$20 sps:$4 sm:$0xff]  }
 0x193   :  { %2709 = vmatprep.subr.bf16.mxu0 %v4643_v36  ;;  %v4835_v36 = vmov 0  }
 0x194   :  { %4138 = vset.pattern.permute.xlu1 %v4835_v36 }
 0x196   :  { %2710 = vmatpush1.bf16.msra.mxu0 %v4641_v39  ;;  %v4673_v39 = vld [vmem:[#allocation6 + $0xfc] ss:$20 sps:$4 sm:$0xff]  }
 0x197   :  { %2711 = vmatprep.subr.bf16.mxu0 %v4646_v40  ;;  %v4671_v40 = vld [vmem:[#allocation6 + $0xf8] ss:$20 sps:$4 sm:$0xff]  }
 0x19a   :  { %2712 = vmatpush2.bf16.msra.mxu0 %v4644_v46  ;;  %v4682_v46 = vld [vmem:[#allocation6 + $0x84] ss:$20 sps:$4 sm:$0xff]  }
 0x19b   :  { %2713 = vmatprep.subr.bf16.mxu0 %v4649_v48  ;;  %v4680_v48 = vld [vmem:[#allocation6 + $0x80] ss:$20 sps:$4 sm:$0xff]  }
 0x19e   :  { %2714 = vmatpush2.bf16.msra.mxu0 %v4647_v13  ;;  %v4691_v13 = vld [vmem:[#allocation6 + $0xc] ss:$20 sps:$4 sm:$0xff]  }
 0x19f   :  { %2715 = vmatprep.subr.bf16.mxu0 %v4652_v54  ;;  %v4689_v54 = vld [vmem:[#allocation6 + $0x8] ss:$20 sps:$4 sm:$0xff]  }
 0x1a2   :  { %2716 = vmatpush2.bf16.msra.mxu0 %v4650_v45  ;;  %v4700_v45 = vld [vmem:[#allocation6 + $0x214] ss:$20 sps:$4 sm:$0xff]  }
 0x1a3   :  { %2717 = vmatprep.subr.bf16.mxu0 %v4655_v55  ;;  %v4703_v55 = vld [vmem:[#allocation6 + $0x1ec] ss:$20 sps:$4 sm:$0xff]  }
 0x1a6   :  { %2718 = vmatpush2.bf16.msra.mxu0 %v4653_v62 }
 0x1a7   :  { %2719 = vmatprep.subr.bf16.mxu0 %v4658_v1 }
 0x1a9   :  { %v1853_v37 = vpop.f32.mrf.mxu0 }
 0x1aa   :  { %v1896_v38 = vpop.f32.mrf.mxu1  ;;  %v1854_v50 = vadd.f32 %v1853_v37, %v358_v28  ;;  %2720 = vmatpush2.bf16.msra.mxu0 %v4656_v8  ;;  %v4668_v37 = vld [vmem:[#allocation6 + $0x120] ss:$20 sps:$4 sm:$0xff]  }
 0x1ab   :  { %v1855_v43 = vpop.f32.mrf.mxu0  ;;  %2721 = vmatprep.subr.bf16.mxu0 %v4661_v25 }
 0x1ac   :  { %v1898_v44 = vpop.f32.mrf.mxu1  ;;  %v1856_v49 = vadd.f32 %v1855_v43, %v362_v12  ;;  %v1897_v31 = vadd.f32 %v1896_v38, %v1854_v50  ;;  %v4670_v38 = vld [vmem:[#allocation6 + $0x124] ss:$20 sps:$4 sm:$0xff]   ;;  %v4679_v43 = vld [vmem:[#allocation6 + $0xac] ss:$20 sps:$4 sm:$0xff]  }
 0x1ad   :  { %v1857_v29 = vpop.f32.mrf.mxu0  ;;  %2948 = vmatprep.subr.bf16.mxu1 %v4670_v38  ;;  %v4692_v50 = vld [vmem:[#allocation6 + $0x260] ss:$20 sps:$4 sm:$0xff]   ;;  %v4710_v38 = vld [vmem:[#allocation6 + $0x170] ss:$20 sps:$4 sm:$0xff]  }
 0x1ae   :  { %v1900_v53 = vpop.f32.mrf.mxu1  ;;  %v1858_v47 = vadd.f32 %v1857_v29, %v358_v28  ;;  %v1899_v58 = vadd.f32 %v1898_v44, %v1856_v49  ;;  %2722 = vmatpush2.bf16.msra.mxu0 %v4659_v26  ;;  %v4677_v44 = vld [vmem:[#allocation6 + $0xa8] ss:$20 sps:$4 sm:$0xff]   ;;  %v4683_v28 = vld [vmem:[#allocation6 + $0x58] ss:$20 sps:$4 sm:$0xff]   ;;  %v4836_v26 = vmov 0.0  }
 0x1af   :  { %v1859_v51 = vpop.f32.mrf.mxu0  ;;  %2723 = vmatprep.subr.bf16.mxu0 %v4664_v30  ;;  %v4688_v29 = vld [vmem:[#allocation6 + $0x34] ss:$20 sps:$4 sm:$0xff]   ;;  %v4694_v49 = vld [vmem:[#allocation6 + $0x264] ss:$20 sps:$4 sm:$0xff]  }
 0x1b0   :  { %v1902_v52 = vpop.f32.mrf.mxu1  ;;  %v1860_v59 = vadd.f32 %v1859_v51, %v362_v12  ;;  %v1901_v63 = vadd.f32 %v1900_v53, %v1858_v47  ;;  %v4685_v12 = vld [vmem:[#allocation6 + $0x5c] ss:$20 sps:$4 sm:$0xff]  }
 0x1b1   :  { %v4686_v53 = vld [vmem:[#allocation6 + $0x30] ss:$20 sps:$4 sm:$0xff]  }
 0x1b2   :  { %v1903_v5 = vadd.f32 %v1902_v52, %v1860_v59  ;;  %2724 = vmatpush2.bf16.msra.mxu0 %v4662_v33  ;;  %v4697_v51 = vld [vmem:[#allocation6 + $0x23c] ss:$20 sps:$4 sm:$0xff]   ;;  %v4695_v52 = vld [vmem:[#allocation6 + $0x238] ss:$20 sps:$4 sm:$0xff]  }
 0x1b3   :  { %2725 = vmatprep.subr.bf16.mxu0 %v4667_v34  ;;  %v4698_v47 = vld [vmem:[#allocation6 + $0x210] ss:$20 sps:$4 sm:$0xff]  }
 0x1b4   :  { %v4709_v34 = vld [vmem:[#allocation6 + $0x19c] ss:$20 sps:$4 sm:$0xff]  }
 0x1b6   :  { %2726 = vmatpush2.bf16.msra.mxu0 %v4665_v35  ;;  %v4707_v35 = vld [vmem:[#allocation6 + $0x198] ss:$20 sps:$4 sm:$0xff]  }
 0x1e9   :  { %v1939_v56 = vpop.f32.mrf.mxu0 }
 0x1ea   :  { %v1982_v57 = vpop.f32.mrf.mxu1  ;;  %v1940_v2 = vadd.f32 %v1939_v56, %v1897_v31  ;;  %v4701_v56 = vld [vmem:[#allocation6 + $0x1e8] ss:$20 sps:$4 sm:$0xff]  }
 0x1eb   :  { %v1941_v60 = vpop.f32.mrf.mxu0 }
 0x1ec   :  { %v1984_v61 = vpop.f32.mrf.mxu1  ;;  %v1942_v0 = vadd.f32 %v1941_v60, %v1899_v58  ;;  %v1983_v14 = vadd.f32 %v1982_v57, %v1940_v2  ;;  %v4706_v57 = vld [vmem:[#allocation6 + $0x1c4] ss:$20 sps:$4 sm:$0xff]   ;;  %v4704_v58 = vld [vmem:[#allocation6 + $0x1c0] ss:$20 sps:$4 sm:$0xff]   ;;  %v3115_v2 = vmul.u32 5, %v4964_v20 }
 0x1ed   :  { %v1943_v3 = vpop.f32.mrf.mxu0  ;;  %v2063_v60 = vld [vmem:[%s5130_s1 + $0x4] sm:$0x3] }
 0x1ee   :  { %v1986_v4 = vpop.f32.mrf.mxu1  ;;  %v1944_v6 = vadd.f32 %v1943_v3, %v1901_v63  ;;  %v1985_v9 = vadd.f32 %v1984_v61, %v1942_v0  ;;  %v1993_v22 = vmax.f32 %v1983_v14, 0.0  ;;  %v2072_v62 = vrot.slane %v2063_v60, %v4975_v32 }
 0x1ef   :  { %v1945_v7 = vpop.f32.mrf.mxu0  ;;  %v2076_v63 = vrot.slane %v2063_v60, %v4967_v27  ;;  %v4993_v14 = vand.u32 127, %v347_v15 }
 0x1f0   :  { %v1987_v10 = vadd.f32 %v1986_v4, %v1944_v6  ;;  %v1946_v11 = vadd.f32 %v1945_v7, %v1903_v5  ;;  %v1988_v16 = vpop.f32.mrf.mxu1  ;;  %v1994_v19 = vmax.f32 %v1985_v9, 0.0 }
 0x1f1   :  { %vm3116_vm0 = vcmp.ge.s32.totalorder %v4993_v14, %v3115_v2 }
 0x1f2   :  { %v1989_v17 = vadd.f32 %v1988_v16, %v1946_v11  ;;  %v1997_v18 = vmax.f32 %v1987_v10, 0.0  ;;  %v3117_v16 = vadd.s32 5, %v3115_v2  ;;  %v4724_v2 = vld [vmem:[#allocation6 + $0x1c8] ss:$20 sps:$4 sm:$0xff]  }
 0x1f4   :  { %v1998_v21 = vmax.f32 %v1989_v17, 0.0  ;;  %v2066_v24 = vpack.c.bf16 %v1997_v18, %v1993_v22  ;;  %vm3118_vm1 = vcmp.lt.s32.totalorder %v4993_v14, %v3117_v16  ;;  %v4732_v16 = vld [vmem:[%s5134_s5 + $0x70] ss:$8 sps:$4 sm:$0xff]  }
 0x1f5   :  { %vm3119_vm3 = vmand %vm3116_vm0, %vm3118_vm1  ;;  %vm3056_vm0 = vcmask 9216   ;;  %vm3586_vm1 = vcmp.lt.s32.totalorder %v4993_v14, 8 }
 0x1f6   :  { %v2067_v23 = vpack.c.bf16 %v1998_v21, %v1994_v19  ;;  %v4003_v30 = vsel %vm3119_vm3, 1.0, %v4836_v26  ;;  %vm3603_vm3 = vcmp.eq.s32.totalorder %v4993_v14, 1 }
 0x1f7   :  { %v3122_v33 = vpack.c.bf16 %v4003_v30, %v4003_v30 }
 0x1f8   :  { %2474 = vmatprep.mubr.bf16.mxu1 %v2067_v23 }
 0x1f9   :  { %2475 = vmatmul.mubr.bf16.vlgmr.msra.gmra.mxu1 %v2066_v24 }
 0x1fa   :  { %2949 = vmatpush1.bf16.msra.mxu1 %v4668_v37  ;;  %v4712_v37 = vld [vmem:[#allocation6 + $0x174] ss:$20 sps:$4 sm:$0xff]  }
 0x1fb   :  { %2950 = vmatprep.subr.bf16.mxu1 %v4673_v39  ;;  %v4715_v39 = vld [vmem:[#allocation6 + $0x14c] ss:$20 sps:$4 sm:$0xff]  }
 0x1fe   :  { %2951 = vmatpush1.bf16.msra.mxu1 %v4671_v40  ;;  %v4713_v40 = vld [vmem:[#allocation6 + $0x148] ss:$20 sps:$4 sm:$0xff]  }
 0x1ff   :  { %2952 = vmatprep.subr.bf16.mxu1 %v4676_v41  ;;  %v2521_v41 = vld [vmem:[%s5130_s1 + $0x6] sm:$0x3] }
 0x202   :  { %2953 = vmatpush1.bf16.msra.mxu1 %v4674_v42 }
 0x203   :  { %2954 = vmatprep.subr.bf16.mxu1 %v4679_v43  ;;  %v2532_v43 = vrot.slane %v2521_v41, %v4967_v27 }
 0x206   :  { %2955 = vmatpush1.bf16.msra.mxu1 %v4677_v44  ;;  %v2528_v44 = vrot.slane %v2521_v41, %v4975_v32 }
 0x207   :  { %2956 = vmatprep.subr.bf16.mxu1 %v4682_v46 }
 0x20a   :  { %2957 = vmatpush1.bf16.msra.mxu1 %v4680_v48 }
 0x20b   :  { %2958 = vmatprep.subr.bf16.mxu1 %v4685_v12 }
 0x20e   :  { %2959 = vmatpush1.bf16.msra.mxu1 %v4683_v28 }
 0x20f   :  { %2960 = vmatprep.subr.bf16.mxu1 %v4688_v29 }
 0x212   :  { %2961 = vmatpush1.bf16.msra.mxu1 %v4686_v53 }
 0x213   :  { %2962 = vmatprep.subr.bf16.mxu1 %v4691_v13 }
 0x216   :  { %2963 = vmatpush1.bf16.msra.mxu1 %v4689_v54 }
 0x217   :  { %2964 = vmatprep.subr.bf16.mxu1 %v4694_v49 }
 0x21a   :  { %2965 = vmatpush2.bf16.msra.mxu1 %v4692_v50 }
 0x21b   :  { %2966 = vmatprep.subr.bf16.mxu1 %v4697_v51 }
 0x21e   :  { %2967 = vmatpush2.bf16.msra.mxu1 %v4695_v52 }
 0x21f   :  { %2968 = vmatprep.subr.bf16.mxu1 %v4700_v45 }
 0x222   :  { %2969 = vmatpush2.bf16.msra.mxu1 %v4698_v47 }
 0x223   :  { %2970 = vmatprep.subr.bf16.mxu1 %v4703_v55  ;;  %v4717_v55 = vld [vmem:[#allocation6 + $0x128] ss:$20 sps:$4 sm:$0xff]  }
 0x226   :  { %2971 = vmatpush2.bf16.msra.mxu1 %v4701_v56 }
 0x227   :  { %2972 = vmatprep.subr.bf16.mxu1 %v4706_v57 }
 0x22a   :  { %2973 = vmatpush2.bf16.msra.mxu1 %v4704_v58  ;;  %v4718_v58 = vld [vmem:[#allocation6 + $0x240] ss:$20 sps:$4 sm:$0xff]  }
 0x22b   :  { %2974 = vmatprep.subr.bf16.mxu1 %v4709_v34  ;;  %v2995_v34 = vld [vmem:[%s5130_s1 + $0xa] sm:$0x3] }
 0x22e   :  { %2975 = vmatpush2.bf16.msra.mxu1 %v4707_v35 }
 0x22f   :  { %2976 = vmatprep.subr.bf16.mxu1 %v4712_v37 }
 0x232   :  { %2977 = vmatpush2.bf16.msra.mxu1 %v4710_v38 }
 0x233   :  { %2978 = vmatprep.subr.bf16.mxu1 %v4715_v39 }
 0x236   :  { %2979 = vmatpush2.bf16.msra.mxu1 %v4713_v40  ;;  %v3000_v40 = vrot.slane %v2995_v34, %v4975_v32 }
 0x239   :  { %v2433_v59 = vpop.f32.mrf.mxu0 }
 0x23a   :  { %v2434_v3 = vadd.f32 %v2433_v59, %v2072_v62 }
 0x23b   :  { %v2435_v31 = vpop.f32.mrf.mxu0 }
 0x23c   :  { %v2436_v5 = vadd.f32 %v2435_v31, %v2076_v63 }
 0x23d   :  { %v2437_v61 = vpop.f32.mrf.mxu0 }
 0x23e   :  { %v2438_v6 = vadd.f32 %v2437_v61, %v2072_v62  ;;  %v4719_v61 = vld [vmem:[#allocation6 + $0x100] ss:$20 sps:$4 sm:$0xff]   ;;  %v4720_v62 = vld [vmem:[#allocation6 + $0x218] ss:$20 sps:$4 sm:$0xff]  }
 0x23f   :  { %v2439_v1 = vpop.f32.mrf.mxu0 }
 0x240   :  { %v2440_v7 = vadd.f32 %v2439_v1, %v2076_v63  ;;  %v4721_v63 = vld [vmem:[#allocation6 + $0xd8] ss:$20 sps:$4 sm:$0xff]   ;;  %v4723_v1 = vld [vmem:[#allocation6 + $0xb0] ss:$20 sps:$4 sm:$0xff]  }
 0x2b9   :  { %v2476_v0 = vpop.f32.mrf.mxu1 }
 0x2ba   :  { %v2477_v8 = vadd.f32 %v2476_v0, %v2434_v3  ;;  %v4722_v0 = vld [vmem:[#allocation6 + $0x1f0] ss:$20 sps:$4 sm:$0xff]   ;;  %v4725_v3 = vld [vmem:[#allocation6 + $0x88] ss:$20 sps:$4 sm:$0xff]  }
 0x2bb   :  { %v2478_v4 = vpop.f32.mrf.mxu1 }
 0x2bc   :  { %v2479_v10 = vadd.f32 %v2478_v4, %v2436_v5  ;;  %v2485_v21 = vmax.f32 %v2477_v8, 0.0  ;;  %v4726_v4 = vld [vmem:[#allocation6 + $0x1a0] ss:$20 sps:$4 sm:$0xff]   ;;  %v4730_v8 = vld [vmem:[#allocation6 + $0x150] ss:$20 sps:$4 sm:$0xff]  }
 0x2bd   :  { %v2480_v9 = vpop.f32.mrf.mxu1  ;;  %v4727_v5 = vld [vmem:[#allocation6 + $0x60] ss:$20 sps:$4 sm:$0xff]  }
 0x2be   :  { %v2481_v11 = vadd.f32 %v2480_v9, %v2438_v6  ;;  %v2486_v22 = vmax.f32 %v2479_v10, 0.0  ;;  %v4728_v6 = vld [vmem:[#allocation6 + $0x178] ss:$20 sps:$4 sm:$0xff]   ;;  %v4731_v9 = vld [vmem:[#allocation6 + $0x10] ss:$20 sps:$4 sm:$0xff]  }
 0x2bf   :  { %v2482_v17 = vpop.f32.mrf.mxu1 }
 0x2c0   :  { %v2487_v18 = vmax.f32 %v2481_v11, 0.0  ;;  %v2483_v19 = vadd.f32 %v2482_v17, %v2440_v7  ;;  %v4729_v7 = vld [vmem:[#allocation6 + $0x38] ss:$20 sps:$4 sm:$0xff]   ;;  %v4733_v17 = vld [vmem:[%s5134_s5 + $0x60] ss:$8 sps:$4 sm:$0xff]  }
 0x2c2   :  { %v2488_v23 = vmax.f32 %v2483_v19, 0.0  ;;  %v2522_v24 = vpack.c.bf16 %v2487_v18, %v2485_v21  ;;  %v4734_v18 = vld [vmem:[%s5134_s5 + $0x50] ss:$8 sps:$4 sm:$0xff]   ;;  %v4735_v19 = vld [vmem:[%s5134_s5 + $0x40] ss:$8 sps:$4 sm:$0xff]  }
 0x2c3   :  { %v4736_v21 = vld [vmem:[%s5134_s5 + $0x30] ss:$8 sps:$4 sm:$0xff]  }
 0x2c4   :  { %v2523_v25 = vpack.c.bf16 %v2488_v23, %v2486_v22  ;;  %v3129_v15 = vsel %vm3127_vm2, %v2522_v24, 0  ;;  %v4737_v22 = vld [vmem:[%s5134_s5 + $0x20] ss:$8 sps:$4 sm:$0xff]   ;;  %v4738_v23 = vld [vmem:[%s5134_s5 + $0x10] ss:$8 sps:$4 sm:$0xff]  }
 0x2c6   :  { %2727 = vmatprep.mubr.bf16.mxu0 %v2523_v25  ;;  %4004 = vmatprep.subr.msk.bf16.mxu0 %vm3127_vm2, %v2523_v25  ;;  %v2774_v25 = vld [vmem:[%s5130_s1 + $0x8] sm:$0x3]  ;;  %vm3100_vm2 = vcmask 8192  }
 0x2c7   :  { %2728 = vmatmul.mubr.bf16.vlgmr.msra.gmra.mxu0 %v2522_v24  ;;  %v4739_v24 = vld [vmem:[%s5134_s5] ss:$8 sps:$4 sm:$0xff]   ;;  %v2785_v30 = vrot.slane %v2774_v25, %v4967_v27 }
 0x2c8   :  { %3149 = vmatpush1.bf16.msra.mxu0 %v3129_v15  ;;  %3166 = vmatprep.mubr.bf16.mxu0 %v4835_v36  ;;  %v4716_v36 = vld [vmem:[#allocation6 + $0x268] ss:$20 sps:$4 sm:$0xff]   ;;  %v2781_v15 = vrot.slane %v2774_v25, %v4975_v32 }
 0x2c9   :  { %4081 = vmatprep.subr.bf16.mxu0 %v4836_v26  ;;  %4041 = vmatprep.subr.bf16.mxu1 %v4716_v36  ;;  %v3004_v36 = vrot.slane %v2995_v34, %v4967_v27 }
 0x2cf   :  { %4005 = vmatmul.mubr.msk.bf16.vlgmr.msra.gmra.mxu0 %vm3123_vm4, %v3122_v33  ;;  %vm3602_vm4 = vcmp.eq.s32.totalorder %v4993_v14, 0 }
 0x2d0   :  { %4082 = vmatpush3.bf16.msra.mxu0 %v4732_v16  ;;  %4097 = vmatprep.mubr.msk.bf16.mxu0 %vm4837_vm5, %v4836_v26 }
 0x2d1   :  { %4083 = vmatprep.subr.bf16.mxu0 %v4836_v26 }
 0x2d4   :  { %4084 = vmatpush3.bf16.msra.mxu0 %v4733_v17 }
 0x2d5   :  { %4085 = vmatprep.subr.bf16.mxu0 %v4836_v26 }
 0x2d8   :  { %4086 = vmatpush3.bf16.msra.mxu0 %v4734_v18 }
 0x2d9   :  { %4087 = vmatprep.subr.bf16.mxu0 %v4836_v26 }
 0x2dc   :  { %4088 = vmatpush3.bf16.msra.mxu0 %v4735_v19 }
 0x2dd   :  { %4089 = vmatprep.subr.bf16.mxu0 %v4836_v26 }
 0x2e0   :  { %4090 = vmatpush3.bf16.msra.mxu0 %v4736_v21 }
 0x2e1   :  { %4091 = vmatprep.subr.bf16.mxu0 %v4836_v26 }
 0x2e4   :  { %4092 = vmatpush3.bf16.msra.mxu0 %v4737_v22  ;;  %v3034_v22 = vmul.u32 5, %v4993_v14 }
 0x2e5   :  { %4093 = vmatprep.subr.bf16.mxu0 %v4836_v26 }
 0x2e6   :  { %vm3035_vm9 = vcmp.ge.s32.totalorder %v4964_v20, %v3034_v22 }
 0x2e8   :  { %4094 = vmatpush3.bf16.msra.mxu0 %v4738_v23  ;;  %v3037_v23 = vadd.s32 5, %v3034_v22 }
 0x2e9   :  { %4095 = vmatprep.subr.bf16.mxu0 %v4836_v26 }
 0x2ea   :  { %vm3038_vm10 = vcmp.lt.s32.totalorder %v4964_v20, %v3037_v23 }
 0x2eb   :  { %vm5095_vm13 = vmand %vm3035_vm9, %vm3038_vm10 }
 0x2ec   :  { %4096 = vmatpush3.bf16.msra.mxu0 %v4739_v24  ;;  %v3031_v24 = vadd.s32 8, %v4964_v20 }
 0x2ee   :  { %vm3036_vm11 = vcmp.ge.s32.totalorder %v3031_v24, %v3034_v22  ;;  %vm3039_vm12 = vcmp.lt.s32.totalorder %v3031_v24, %v3037_v23 }
 0x2ef   :  { %vm5099_vm14 = vmand %vm3036_vm11, %vm3039_vm12 }
 0x387   :  { %v2729_v42 = vpop.f32.mrf.mxu0 }
 0x388   :  { %v2730_v29 = vadd.f32 %v2729_v42, %v2528_v44 }
 0x389   :  { %v2731_v46 = vpop.f32.mrf.mxu0 }
 0x38a   :  { %v2732_v12 = vadd.f32 %v2731_v46, %v2532_v43  ;;  %v2738_v52 = vmax.f32 %v2730_v29, 0.0 }
 0x38b   :  { %v2733_v48 = vpop.f32.mrf.mxu0 }
 0x38c   :  { %v2734_v28 = vadd.f32 %v2733_v48, %v2528_v44  ;;  %v2739_v50 = vmax.f32 %v2732_v12, 0.0 }
 0x38d   :  { %v2735_v53 = vpop.f32.mrf.mxu0 }
 0x38e   :  { %v2736_v13 = vadd.f32 %v2735_v53, %v2532_v43  ;;  %v2740_v54 = vmax.f32 %v2734_v28, 0.0 }
 0x38f   :  { %v3168_v49 = vpop.f32.mrf.mxu0 }
 0x390   :  { %v2741_v51 = vmax.f32 %v2736_v13, 0.0  ;;  %v2775_v57 = vpack.c.bf16 %v2740_v54, %v2738_v52  ;;  %v3175_v10 = vmul.f32 0.2, %v3168_v49 }
 0x391   :  { %v3170_v45 = vpop.f32.mrf.mxu0 }
 0x392   :  { %v2776_v47 = vpack.c.bf16 %v2741_v51, %v2739_v50  ;;  %v3176_v56 = vmul.f32 0.2, %v3170_v45  ;;  %v3210_v11 = vpack.c.bf16 %v3175_v10, %v3175_v10  ;;  %v4006_v51 = vld [vmem:[%s5130_s1 + $0xd] ss:$0 sm:$0xff] }
 0x393   :  { %v3172_v59 = vpop.f32.mrf.mxu0 }
 0x394   :  { %2980 = vmatprep.mubr.bf16.mxu1 %v2776_v47  ;;  %v3211_v31 = vpack.c.bf16 %v3176_v56, %v3176_v56  ;;  %v4740_v59 = vld [vmem:[%s5134_s5 + $0x74] ss:$8 sps:$4 sm:$0xff]  }
 0x395   :  { %2981 = vmatmul.mubr.bf16.vlgmr.msra.gmra.mxu1 %v2775_v57  ;;  %v3173_v60 = vpop.f32.mrf.mxu0 }
 0x396   :  { %4042 = vmatpush3.bf16.msra.mxu1 %v4717_v55  ;;  %3346 = vmatprep.mubr.bf16.mxu1 %v3211_v31  ;;  %v4741_v31 = vld [vmem:[%s5134_s5 + $0x64] ss:$8 sps:$4 sm:$0xff]   ;;  %v4742_v60 = vld [vmem:[%s5134_s5 + $0x54] ss:$8 sps:$4 sm:$0xff]  }
 0x397   :  { %4043 = vmatprep.subr.bf16.mxu1 %v4718_v58 }
 0x39a   :  { %4044 = vmatpush3.bf16.msra.mxu1 %v4719_v61  ;;  %v4743_v61 = vld [vmem:[%s5134_s5 + $0x44] ss:$8 sps:$4 sm:$0xff]  }
 0x39b   :  { %4045 = vmatprep.subr.bf16.mxu1 %v4720_v62  ;;  %v4744_v62 = vld [vmem:[%s5134_s5 + $0x34] ss:$8 sps:$4 sm:$0xff]  }
 0x39e   :  { %4046 = vmatpush3.bf16.msra.mxu1 %v4721_v63  ;;  %v4745_v63 = vld [vmem:[%s5134_s5 + $0x24] ss:$8 sps:$4 sm:$0xff]  }
 0x39f   :  { %4047 = vmatprep.subr.bf16.mxu1 %v4722_v0  ;;  %v4746_v0 = vld [vmem:[%s5134_s5 + $0x14] ss:$8 sps:$4 sm:$0xff]  }
 0x3a2   :  { %4048 = vmatpush3.bf16.msra.mxu1 %v4723_v1  ;;  %v4747_v1 = vld [vmem:[%s5134_s5 + $0x4] ss:$8 sps:$4 sm:$0xff]  }
 0x3a3   :  { %4049 = vmatprep.subr.bf16.mxu1 %v4724_v2  ;;  %v4002_v2 = vld [vmem:[%s5130_s1 + $0xc] ss:$0 sm:$0xff] }
 0x3a6   :  { %4050 = vmatpush3.bf16.msra.mxu1 %v4725_v3 }
 0x3a7   :  { %4051 = vmatprep.subr.bf16.mxu1 %v4726_v4 }
 0x3aa   :  { %4052 = vmatpush3.bf16.msra.mxu1 %v4727_v5 }
 0x3ab   :  { %4053 = vmatprep.subr.bf16.mxu1 %v4728_v6 }
 0x3ae   :  { %4054 = vmatpush3.bf16.msra.mxu1 %v4729_v7 }
 0x3af   :  { %4055 = vmatprep.subr.bf16.mxu1 %v4730_v8 }
 0x3b2   :  { %4056 = vmatpush3.bf16.msra.mxu1 %v4731_v9  ;;  %v4023_v9 = vld [vmem:[%s5130_s1 + $0xe] ss:$0 sm:$0xff] }
 0x3b3   :  { %4101 = vmatprep.subr.bf16.mxu1 %v4836_v26 }
 0x3b5   :  { %3347 = vmatmul.mubr.bf16.vlgmr.msra.gmra.mxu1 %v3210_v11 }
 0x3b6   :  { %4117 = vmatprep.mubr.msk.bf16.mxu1 %vm4837_vm5, %v4836_v26  ;;  %4102 = vmatpush3.bf16.msra.mxu1 %v4740_v59 }
 0x3b7   :  { %4103 = vmatprep.subr.bf16.mxu1 %v4836_v26 }
 0x3ba   :  { %4104 = vmatpush3.bf16.msra.mxu1 %v4741_v31 }
 0x3bb   :  { %4105 = vmatprep.subr.bf16.mxu1 %v4836_v26 }
 0x3be   :  { %4106 = vmatpush3.bf16.msra.mxu1 %v4742_v60 }
 0x3bf   :  { %4107 = vmatprep.subr.bf16.mxu1 %v4836_v26 }
 0x3c2   :  { %4108 = vmatpush3.bf16.msra.mxu1 %v4743_v61 }
 0x3c3   :  { %4109 = vmatprep.subr.bf16.mxu1 %v4836_v26 }
 0x3c6   :  { %4110 = vmatpush3.bf16.msra.mxu1 %v4744_v62  ;;  %v4032_v62 = vld [vmem:[%s5130_s1 + $0xf] ss:$0 sm:$0xff] }
 0x3c7   :  { %4111 = vmatprep.subr.bf16.mxu1 %v4836_v26 }
 0x3ca   :  { %4112 = vmatpush3.bf16.msra.mxu1 %v4745_v63 }
 0x3cb   :  { %4113 = vmatprep.subr.bf16.mxu1 %v4836_v26 }
 0x3ce   :  { %4114 = vmatpush3.bf16.msra.mxu1 %v4746_v0 }
 0x3cf   :  { %4115 = vmatprep.subr.bf16.mxu1 %v4836_v26 }
 0x3d2   :  { %4116 = vmatpush3.bf16.msra.mxu1 %v4747_v1 }
 0x455   :  { %v2982_v33 = vpop.f32.mrf.mxu1 }
 0x456   :  { %v2983_v35 = vadd.f32 %v2982_v33, %v2781_v15 }
 0x457   :  { %v2984_v37 = vpop.f32.mrf.mxu1 }
 0x458   :  { %v2991_v38 = vmax.f32 %v2983_v35, 0.0  ;;  %v2985_v39 = vadd.f32 %v2984_v37, %v2785_v30 }
 0x459   :  { %v2986_v41 = vpop.f32.mrf.mxu1 }
 0x45a   :  { %v2992_v42 = vmax.f32 %v2985_v39, 0.0  ;;  %v2987_v43 = vadd.f32 %v2986_v41, %v2781_v15  ;;  %v3007_v12 = vmul.f32 %v3000_v40, %v2991_v38 }
 0x45b   :  { %v2988_v44 = vpop.f32.mrf.mxu1 }
 0x45c   :  { %v2993_v46 = vmax.f32 %v2987_v43, 0.0  ;;  %v2989_v48 = vadd.f32 %v2988_v44, %v2785_v30  ;;  %v3008_v28 = vmul.f32 %v3004_v36, %v2992_v42 }
 0x45e   :  { %v3009_v29 = vmul.f32 %v3000_v40, %v2993_v46  ;;  %v2994_v53 = vmax.f32 %v2989_v48, 0.0  ;;  %v3011_v13 = vadd.f32 %v3008_v28, %v3007_v12 }
 0x460   :  { %v3010_v54 = vmul.f32 %v3004_v36, %v2994_v53  ;;  %3012 = vadd.xlane.f32.xlu0 %v3011_v13  ;;  %v3015_v49 = vsel %vm3014_vm6, %v3009_v29, 0.0 }
 0x462   :  { %v3016_v32 = vsel %vm3014_vm6, %v3010_v54, 0.0 }
 0x463   :  { %v3017_v50 = vadd.f32 %v3016_v32, %v3015_v49 }
 0x465   :  { %3018 = vadd.xlane.f32.xlu0 %v3017_v50 }
 0x475   :  { %v4057_v27 = vpop.f32.mrf.mxu1 }
 0x477   :  { %v4058_v52 = vpop.f32.mrf.mxu1 }
 0x478   :  { %v4059_v45 = vadd.f32 %v4058_v52, %v4057_v27 }
 0x479   :  { %v4060_v47 = vpop.f32.mrf.mxu1 }
 0x47a   :  { %v3349_v55 = vadd.f32 %v4059_v45, %v4006_v51 }
 0x47b   :  { %v4061_v56 = vpop.f32.mrf.mxu1 }
 0x47c   :  { %v3354_v57 = vmax.f32 %v3349_v55, 0.0 }
 0x47e   :  { %v3372_v58 = vpack.c.bf16 %v3354_v57, %v3354_v57 }
 0x480   :  { %4098 = vmatmul.mubr.bf16.vlgmr.msra.gmra.mxu0 %v3372_v58 }
 0x4e9   :  { %v3013_v3 = vpop.xlane.xlu0 %3012 }
 0x4ea   :  { %v3027_v4 = vadd.f32 %v4002_v2, %v3013_v3 }
 0x4ec   :  { %3044 = vperm.xlu1 %4138, %v3027_v4   ;;  %v3086_v8 = vsel %vm3085_vm8, %v3027_v4, 0.0 }
 0x4ee   :  { %v3019_v5 = vpop.xlane.xlu0 %3018 }
 0x4ef   :  { %v3028_v6 = vadd.f32 %v4002_v2, %v3019_v5 }
 0x4f1   :  { %3049 = vperm.xlu1 %4138, %v3028_v6   ;;  %v3088_v7 = vsel %vm3087_vm7, %v3028_v6, 0.0 }
 0x4f2   :  { %v3089_v26 = vadd.f32 %v3088_v7, %v3086_v8 }
 0x515   :  { %3090 = vadd.xlane.f32.xlu1 %v3089_v26  ;;  %v4838_v26 = vmov 127  }
 0x516   :  { %4139 = vset.pattern.permute.xlu0 %v4838_v26 }
 0x540   :  { %v3461_v10 = vpop.f32.mrf.mxu0 }
 0x541   :  { %v3462_v11 = vadd.f32 %v4023_v9, %v3461_v10 }
 0x542   :  { %v4099_v16 = vpop.f32.mrf.mxu0 }
 0x543   :  { %v3467_v17 = vmax.f32 %v3462_v11, 0.0 }
 0x544   :  { %v3464_v18 = vpop.f32.mrf.mxu0 }
 0x545   :  { %v3485_v19 = vpack.c.bf16 %v3467_v17, %v3467_v17 }
 0x546   :  { %v4100_v21 = vpop.f32.mrf.mxu0 }
 0x547   :  { %4118 = vmatmul.mubr.bf16.vlgmr.msra.gmra.mxu1 %v3485_v19 }
 0x567   :  { %v3045_v25 = vpop.permute.xlu1 %3044 }
 0x568   :  { %v3052_v33 = vsel %vm5095_vm13, %v3045_v25, -1e+30 }
 0x569   :  { %v3055_v35 = vsel %vm3054_vm15, %v3052_v33, -inf }
 0x56c   :  { %v3050_v34 = vpop.permute.xlu1 %3049 }
 0x56d   :  { %v3053_v20 = vsel %vm5099_vm14, %v3050_v34, -1e+30 }
 0x56e   :  { %v3057_v37 = vsel %vm3056_vm0, %v3053_v20, -inf }
 0x56f   :  { %v3058_v38 = vmax.f32 %v3055_v35, %v3057_v37 }
 0x571   :  { %v3059_v39 = vrot.slane %v3058_v38, 4 }
 0x573   :  { %v3060_v40 = vmax.f32 %v3058_v38, %v3059_v39 }
 0x575   :  { %v3061_v36 = vrot.slane %v3060_v40, 2 }
 0x577   :  { %v3062_v41 = vmax.f32 %v3060_v40, %v3061_v36 }
 0x579   :  { %v3063_v42 = vrot.slane %v3062_v41, 1 }
 0x57b   :  { %v3064_v43 = vmax.f32 %v3062_v41, %v3063_v42 }
 0x57d   :  { %v3065_v44 = vsub.f32 %v3045_v25, %v3064_v43  ;;  %v3066_v46 = vsub.f32 %v3050_v34, %v3064_v43 }
 0x57f   :  { %v3067_v48 = vmul.f32 1.442695, %v3065_v44  ;;  %v3069_v12 = vmul.f32 1.442695, %v3066_v46 }
 0x581   :  { %4748 = vpow2.f32 %v3067_v48 }
 0x582   :  { %4750 = vpow2.f32 %v3069_v12 }
 0x58e   :  { %v4749_v28 = vpop.eup %4748 }
 0x58f   :  { %v4751_v29 = vpop.eup %4750  ;;  %v3071_v53 = vsel %vm5095_vm13, %v4749_v28, 0.0 }
 0x590   :  { %v3072_v13 = vsel %vm5099_vm14, %v4751_v29, 0.0  ;;  %v3073_v54 = vsel %vm3054_vm15, %v3071_v53, 0.0 }
 0x591   :  { %v3074_v49 = vsel %vm3056_vm0, %v3072_v13, 0.0 }
 0x592   :  { %v3075_v32 = vadd.f32 %v3074_v49, %v3073_v54 }
 0x594   :  { %v3076_v56 = vrot.slane %v3075_v32, 4 }
 0x596   :  { %v3077_v57 = vadd.f32 %v3076_v56, %v3075_v32 }
 0x598   :  { %v3078_v58 = vrot.slane %v3077_v57, 2 }
 0x59a   :  { %v3079_v59 = vadd.f32 %v3078_v58, %v3077_v57 }
 0x59c   :  { %v3080_v31 = vrot.slane %v3079_v59, 1 }
 0x59e   :  { %v3091_v50 = vpop.xlane.xlu1 %3090  ;;  %v3081_v60 = vadd.f32 %v3080_v31, %v3079_v59 }
 0x59f   :  { %v3092_v27 = vrot.slane %v3091_v50, 4 }
 0x5a0   :  { %4752 = vlog2.f32 %v3081_v60 }
 0x5a1   :  { %v3093_v51 = vadd.f32 %v3092_v27, %v3091_v50 }
 0x5a3   :  { %v3094_v52 = vrot.slane %v3093_v51, 2 }
 0x5a5   :  { %v3095_v45 = vadd.f32 %v3094_v52, %v3093_v51 }
 0x5a7   :  { %v3096_v47 = vrot.slane %v3095_v45, 1 }
 0x5a9   :  { %v3097_v55 = vadd.f32 %v3096_v47, %v3095_v45 }
 0x5ab   :  { %4121 = vpush %v3097_v55 }
 0x5ad   :  { %v4753_v61 = vpop.eup %4752 }
 0x5ae   :  { %v3083_v0 = vmul.f32 0.6931472, %v4753_v61 }
 0x5b0   :  { %v3084_v6 = vadd.f32 %v3083_v0, %v3064_v43 }
 0x5b2   :  { %v3101_v8 = vsel %vm3100_vm2, %v3084_v6, 0.0 }
 0x5dc   :  { %s4122_s1 = spop %4121 }
 0x5dd   :  { %v3099_v38 = vstv %s4122_s1 }
 0x607   :  { %v3574_v63 = vpop.f32.mrf.mxu1 }
 0x608   :  { %v3575_v1 = vadd.f32 %v4032_v62, %v3574_v63 }
 0x609   :  { %v4119_v2 = vpop.f32.mrf.mxu1 }
 0x60a   :  { %v3587_v3 = vsel %vm3586_vm1, %v3575_v1, -1e+30  ;;  %v3580_v9 = vsub.f32 0.0, %v3575_v1 }
 0x60b   :  { %v3577_v4 = vpop.f32.mrf.mxu1  ;;  %v3588_v5 = vsel %vm3014_vm6, %v3587_v3, -inf }
 0x60c   :  { %3589 = vmax.xlane.f32.xlu0 %v3588_v5  ;;  %v3581_v17 = vmul.f32 1.442695, %v3580_v9 }
 0x60d   :  { %v4120_v7 = vpop.f32.mrf.mxu1 }
 0x610   :  { %3102 = vadd.xlane.f32.xlu0 %v3101_v8 }
 0x695   :  { %v3590_v10 = vpop.xlane.xlu0 %3589 }
 0x696   :  { %v3591_v11 = vsub.f32 %v3587_v3, %v3590_v10 }
 0x698   :  { %v3592_v16 = vmul.f32 1.442695, %v3591_v11 }
 0x699   :  { %v3103_v18 = vpop.xlane.xlu0 %3102 }
 0x69a   :  { %4754 = vpow2.f32 %v3592_v16  ;;  %v3104_v19 = vrot.slane %v3103_v18, 4 }
 0x69b   :  { %4756 = vpow2.f32 %v3581_v17 }
 0x69c   :  { %v3105_v21 = vadd.f32 %v3104_v19, %v3103_v18 }
 0x69e   :  { %v3106_v22 = vrot.slane %v3105_v21, 2 }
 0x6a0   :  { %v3107_v23 = vadd.f32 %v3106_v22, %v3105_v21 }
 0x6a2   :  { %v3108_v24 = vrot.slane %v3107_v23, 1 }
 0x6a4   :  { %v3109_v25 = vadd.f32 %v3108_v24, %v3107_v23 }
 0x6a6   :  { %4123 = vpush %v3109_v25 }
 0x6a7   :  { %v4755_v15 = vpop.eup %4754 }
 0x6a8   :  { %v3594_v30 = vsel %vm3014_vm6, %v4755_v15, 0.0  ;;  %v4757_v33 = vpop.eup %4756 }
 0x6a9   :  { %3595 = vadd.xlane.f32.xlu0 %v3594_v30  ;;  %v3583_v34 = vadd.f32 1.0, %v4757_v33 }
 0x6ab   :  { %4758 = vrcp.f32 %v3583_v34 }
 0x6b8   :  { %v4759_v20 = vpop.eup %4758 }
 0x6bf   :  { %3607 = vperm.xlu0 %4139, %v4759_v20  }
 0x6d7   :  { %s4124_s15 = spop %4123 }
 0x6d8   :  { %v3111_v35 = vstv %s4124_s15 }
 0x6d9   :  { %v3112_v37 = vmul.f32 5.0, %v3111_v35 }
 0x6db   :  { %v3113_v39 = vsub.f32 %v3099_v38, %v3112_v37 }
 0x6dd   :  { %v3114_v36 = vmul.f32 0.1, %v3113_v39 }
 0x6df   :  { %v3604_v41 = vsel %vm3603_vm3, %v3114_v36, 0.0 }
 0x732   :  { %v3596_v40 = vpop.xlane.xlu0 %3595 }
 0x733   :  { %4760 = vlog2.f32 %v3596_v40 }
 0x73a   :  { %v3608_v42 = vpop.permute.xlu0 %3607 }
 0x73b   :  { %v3610_v43 = vsel %vm3602_vm4, %v3608_v42, %v3604_v41 }
 0x73c   :  { %3611 = vst [vmem:[%s5135_s6 + $0x2] sm:$0x3] %v3610_v43 }
 0x740   :  { %v4761_v44 = vpop.eup %4760 }
 0x741   :  { %v3598_v46 = vmul.f32 0.6931472, %v4761_v44 }
 0x743   :  { %v3599_v48 = vadd.f32 %v3598_v46, %v3590_v10 }
 0x745   :  { %v3600_v12 = vsub.f32 %v3587_v3, %v3599_v48 }
 0x747   :  { %3601 = vst [vmem:[%s5135_s6] sm:$0x3] %v3600_v12 }
 0x748   :  { %3616 = vsyncpa [#allocation3], 1 }
 0x749   :  { %3617 = vsyncpa [#allocation5], 1 }

</bundles_post_ra>
